<compile_context>
chip_gen: v6e
topology: v6e:2x2x1
jax: 0.10.0
libtpu: 0.0.40
codegen_flags: <defaults>
</compile_context>

<pallas_src>
import jax
import jax.numpy as jnp
from jax import lax
from jax.experimental import pallas as pl
from jax.experimental.pallas import tpu as pltpu

# ----------------------------- model hyper-params ---------------------------
VOCAB = 64        # len(emb_vals)
EMB_DIM = 32      # embedding_dim
N_NODES = 8       # n = int(sys.argv[1])  -> 1 node + 7 neighbours
OUT_DIM = 300     # nn.Linear(2 * embedding_dim, 300)
BATCH = 32        # (query, candidate) pairs folded into one pallas_call


# --------------------------------- kernel -----------------------------------
def siamese_kernel(idx_ref, emb_ref, v_ref, w_ref, b_ref, o_ref):
    """Fused embedding-gather + attention + linear + cosine, both branches.

    Per grid step (one batch block of BB pairs):
      idx_ref : (2*BB*N, 1) int32  token ids, rows ordered [side0 | side1],
                                   each side batch-major, N tokens per graph
      emb_ref : (V, E)     f32     frozen embedding table      (resident)
      v_ref   : (1, K)     f32     neighbour-mixing weights    (resident)
      w_ref   : (2E, OP)   f32     Linear(2E,300) weight, zero-padded to OP=384
      b_ref   : (1, OP)    f32     bias, zero-padded
      o_ref   : (BB, 1)    f32     cosine similarity for this block
    """
    vocab, e = emb_ref.shape
    k = v_ref.shape[1]
    n = k + 1
    b = o_ref.shape[0]          # batch pairs in this block (BB)
    bb = 2 * b                  # both sides stacked along the row axis

    # ---- embedding lookup: one-hot @ table (exact index match, MXU matmul) ----
    idx = idx_ref[...]                                            # (2BB*N, 1)
    iota = lax.broadcasted_iota(jnp.int32, (1, vocab), 1)         # (1, V)
    onehot = (idx == iota).astype(jnp.float32)                    # (2BB*N, V)
    x = jnp.dot(onehot, emb_ref[...],
                preferred_element_type=jnp.float32)               # (2BB*N, E)
    x = x.reshape(bb, n, e)                                       # (2BB, N, E)

    node = x[:, 0, :]                                             # (2BB, E)
    neigh = x[:, 1:, :]                                           # (2BB, K, E)

    # ---- attention logits, K on the lane axis ----
    att = jnp.sum(neigh * node[:, None, :], axis=-1)              # (2BB, K)

    # masked_softmax: exact-zero logits get -9999 ADDED before softmax
    att = att + ((att != 0.0).astype(jnp.float32) - 1.0) * 9999.0
    att = att - jnp.max(att, axis=-1, keepdims=True)
    ex = jnp.exp(att)
    p = ex / jnp.sum(ex, axis=-1, keepdims=True)                  # (2BB, K)

    # ---- context = v @ (att_weights * neighbours) ----
    pv = p * v_ref[...]                                           # (2BB, K)
    ctx = jnp.sum(pv[:, :, None] * neigh, axis=1)                 # (2BB, E)

    # ---- Linear(2E, OUT): one MXU matmul on concat([node, ctx]) ----
    feat = jnp.concatenate([node, ctx], axis=-1)                  # (2BB, 2E)
    r = jnp.dot(feat, w_ref[...],
                preferred_element_type=jnp.float32) + b_ref[...]  # (2BB, OP)

    # Side split is whole-8-sublane-tile aligned because BB % 8 == 0.
    r0 = r[:b, :]                                                 # (BB, OP)
    r1 = r[b:, :]                                                 # (BB, OP)

    # ---- CosineSimilarity(dim=1), eps = 1e-8 ----
    # max(||r||, eps) == sqrt(max(||r||^2, eps^2)); rsqrt keeps this on EUP.
    eps2 = jnp.float32(1e-16)
    dotp = jnp.sum(r0 * r1, axis=-1, keepdims=True)               # (BB, 1)
    ss0 = jnp.sum(r0 * r0, axis=-1, keepdims=True)
    ss1 = jnp.sum(r1 * r1, axis=-1, keepdims=True)
    o_ref[...] = (dotp
                  * lax.rsqrt(jnp.maximum(ss0, eps2))
                  * lax.rsqrt(jnp.maximum(ss1, eps2)))


# ------------------------ init-time parameter prep ---------------------------
def prepare_params(emb, v, w, bias):
    """One-time parameter preprocessing, hoisted OFF the per-call jit path."""
    out = w.shape[1]
    out_pad = ((out + 127) // 128) * 128           # 300 -> 384, lane-dense
    emb_f32 = jnp.asarray(emb, jnp.float32)
    v_row = jnp.asarray(v, jnp.float32).reshape(1, -1)
    w_pad = jnp.pad(jnp.asarray(w, jnp.float32), ((0, 0), (0, out_pad - out)))
    b_pad = jnp.pad(jnp.asarray(bias, jnp.float32),
                    (0, out_pad - out)).reshape(1, out_pad)
    return emb_f32, v_row, w_pad, b_pad


def _pick_block(b):
    # Prefer per-side blocks that are multiples of 8 so the side split stays
    # sublane-tile aligned and the gather matmul reaches >=256 MXU rows.
    for cand in (16, 8):
        if b % cand == 0:
            return cand
    return b            # tiny / odd batches: single block (still correct)


# -------------------------------- wrapper ------------------------------------
@jax.jit
def siamese_forward(inputs, emb, v_row, w_pad, b_pad):
    """inputs: (B, 2, N) int32 token indices; returns (B,) cosine similarities.

    emb / v_row / w_pad / b_pad must come from prepare_params() (pre-padded,
    pre-cast) so the only per-call work is the index re-layout + the kernel.
    """
    B, _, N = inputs.shape
    K = N - 1
    V, E = emb.shape
    OP = w_pad.shape[1]

    BB = _pick_block(B)
    G = B // BB

    # Per-block stacking: block g holds [side0 rows | side1 rows] of its BB
    # pairs (batch-major, N tokens each), so r[:BB]/r[BB:] inside the kernel
    # are whole-tile aligned and every block is a contiguous window (one DMA).
    idx = (inputs.astype(jnp.int32)
           .reshape(G, BB, 2, N)
           .transpose(0, 2, 1, 3)                  # (G, 2, BB, N)
           .reshape(G * 2 * BB * N, 1))

    # Advisory cost so XLA can overlap this small custom call with neighbours.
    flops = 2 * (2 * B * N * V * E + 2 * B * (2 * E) * OP)
    bytes_accessed = 4 * (idx.size + emb.size + v_row.size
                          + w_pad.size + b_pad.size + B)
    cost = pl.CostEstimate(flops=flops,
                           transcendentals=2 * B * K,
                           bytes_accessed=bytes_accessed)

    out = pl.pallas_call(
        siamese_kernel,
        out_shape=jax.ShapeDtypeStruct((B, 1), jnp.float32),
        grid=(G,),
        in_specs=[
            pl.BlockSpec((2 * BB * N, 1), lambda i: (i, 0)),   # per-block ids
            pl.BlockSpec((V, E), lambda i: (0, 0)),            # resident
            pl.BlockSpec((1, K), lambda i: (0, 0)),            # resident
            pl.BlockSpec((2 * E, OP), lambda i: (0, 0)),       # resident
            pl.BlockSpec((1, OP), lambda i: (0, 0)),           # resident
        ],
        out_specs=pl.BlockSpec((BB, 1), lambda i: (i, 0)),
        compiler_params=pltpu.CompilerParams(
            dimension_semantics=("parallel",)),                # v7x: 2 TCs
        cost_estimate=cost,
    )(idx, emb, v_row, w_pad, b_pad)
    return out[:, 0]


# ----------------------- pure-JAX reference (for checking) -------------------
def siamese_reference(inputs, emb, v, w, bias):
    x = jnp.take(emb, inputs, axis=0)            # (B, 2, N, E)
    results = []
    for i in range(2):
        xi = x[:, i]                             # (B, N, E)
        node = xi[:, 0:1, :]
        neigh = xi[:, 1:, :]
        att = jnp.einsum('bke,bqe->bk', neigh, node)
        mask = (att != 0.0).astype(jnp.float32)
        att = att + (mask - 1.0) * 9999.0
        p = jax.nn.softmax(att, axis=-1)[..., None]
        ctx = jnp.einsum('k,bke->be', v, p * neigh)
        feat = jnp.concatenate([xi[:, 0, :], ctx], axis=1)
        results.append(feat @ w + bias)
    r0, r1 = results
    eps = 1e-8
    num = jnp.sum(r0 * r1, axis=-1)
    den = (jnp.maximum(jnp.linalg.norm(r0, axis=-1), eps)
           * jnp.maximum(jnp.linalg.norm(r1, axis=-1), eps))
    return num / den


# ---------------------------------- main --------------------------------------
if __name__ == "__main__":
    key = jax.random.PRNGKey(0)
    k_emb, k_idx, k_w, k_b = jax.random.split(key, 4)

    # Deterministic synthetic parameters (module __init__ shapes).
    emb_vals = jax.random.normal(k_emb, (VOCAB, EMB_DIM), dtype=jnp.float32)
    v_param = jnp.full((N_NODES - 1,), 1.0 / (N_NODES - 1), dtype=jnp.float32)
    # Linear(2E, OUT): stored pre-transposed as (2E, OUT).
    w_out = jax.random.normal(k_w, (2 * EMB_DIM, OUT_DIM), dtype=jnp.float32) * 0.05
    b_out = jax.random.normal(k_b, (OUT_DIM,), dtype=jnp.float32) * 0.05

    # One-time parameter prep (hoisted out of the forward path).
    params = prepare_params(emb_vals, v_param, w_out, b_out)

    # Example input: (B, 2, N) token indices — many pairs per call.
    inputs = jax.random.randint(k_idx, (BATCH, 2, N_NODES), 0, VOCAB,
                                dtype=jnp.int32)

    out = siamese_forward(inputs, *params)
    out = jax.block_until_ready(out)

    ref = siamese_reference(inputs, emb_vals, v_param, w_out, b_out)
    assert out.shape == (BATCH,), out.shape
    # Tolerance: kernel uses default-precision MXU matmuls + EUP rsqrt for the
    # cosine denominator vs. the reference's exact gather and sqrt + divide.
    assert jnp.allclose(out, ref, rtol=1e-3, atol=2e-4), (out, ref)

    print("KERNEL_OK")
</pallas_src>

<mosaic_0001>
module attributes {stable_mosaic.version = 11 : i64} {
  func.func @siamese_kernel(%arg0: i32, %arg1: memref<256x1xi32, #tpu.memory_space<vmem>>, %arg2: memref<64x32xf32, #tpu.memory_space<vmem>>, %arg3: memref<1x7xf32, #tpu.memory_space<vmem>>, %arg4: memref<64x384xf32, #tpu.memory_space<vmem>>, %arg5: memref<1x384xf32, #tpu.memory_space<vmem>>, %arg6: memref<16x1xf32, #tpu.memory_space<vmem>>) attributes {dimension_semantics = [#tpu.dimension_semantics<parallel>], iteration_bounds = array<i64: 2>, scalar_prefetch = 0 : i64, scratch_operands = 0 : i64, tpu.core_type = #tpu.core_type<tc>, window_params = [{transform_indices = @transform_0, window_bounds = array<i64: 256, 1>}, {pipeline_mode = #tpu.pipeline_mode<synchronous>, transform_indices = @transform_1, window_bounds = array<i64: 64, 32>}, {pipeline_mode = #tpu.pipeline_mode<synchronous>, transform_indices = @transform_2, window_bounds = array<i64: 1, 7>}, {pipeline_mode = #tpu.pipeline_mode<synchronous>, transform_indices = @transform_3, window_bounds = array<i64: 64, 384>}, {pipeline_mode = #tpu.pipeline_mode<synchronous>, transform_indices = @transform_4, window_bounds = array<i64: 1, 384>}, {transform_indices = @transform_5, window_bounds = array<i64: 16, 1>}]} {
    %c0 = arith.constant 0 : index
    %c0_0 = arith.constant 0 : index
    %0 = vector.load %arg1[%c0, %c0_0] : memref<256x1xi32, #tpu.memory_space<vmem>>, vector<256x1xi32>
    %1 = tpu.iota {dimensions = array<i32: 1>} : vector<1x64xi32>
    %2 = vector.broadcast %0 : vector<256x1xi32> to vector<256x64xi32>
    %3 = vector.broadcast %1 : vector<1x64xi32> to vector<256x64xi32>
    %4 = arith.cmpi eq, %2, %3 : vector<256x64xi32>
    %5 = arith.extui %4 : vector<256x64xi1> to vector<256x64xi32>
    %6 = arith.sitofp %5 : vector<256x64xi32> to vector<256x64xf32>
    %c0_1 = arith.constant 0 : index
    %c0_2 = arith.constant 0 : index
    %7 = vector.load %arg2[%c0_1, %c0_2] : memref<64x32xf32, #tpu.memory_space<vmem>>, vector<64x32xf32>
    %cst = arith.constant dense<0.000000e+00> : vector<256x32xf32>
    %8 = tpu.matmul %6, %7, %cst {dimension_numbers = #tpu.dot_dimension_numbers<[1], [0], [0], [1], [0, 0, 1, 1], [], []>} : vector<256x64xf32>, vector<64x32xf32>, vector<256x32xf32> -> vector<256x32xf32>
    %9 = vector.shape_cast %8 : vector<256x32xf32> to vector<32x8x32xf32>
    %10 = vector.extract_strided_slice %9 {offsets = [0, 0, 0], sizes = [32, 1, 32], strides = [1, 1, 1]} : vector<32x8x32xf32> to vector<32x1x32xf32>
    %11 = vector.shape_cast %10 : vector<32x1x32xf32> to vector<32x32xf32>
    %12 = vector.extract_strided_slice %9 {offsets = [0, 1, 0], sizes = [32, 7, 32], strides = [1, 1, 1]} : vector<32x8x32xf32> to vector<32x7x32xf32>
    %13 = vector.shape_cast %11 : vector<32x32xf32> to vector<32x1x32xf32>
    %14 = vector.broadcast %13 : vector<32x1x32xf32> to vector<32x7x32xf32>
    %15 = arith.mulf %12, %14 : vector<32x7x32xf32>
    %cst_3 = arith.constant dense<0.000000e+00> : vector<32x7xf32>
    %16 = vector.multi_reduction <add>, %15, %cst_3 [2] : vector<32x7x32xf32> to vector<32x7xf32>
    %cst_4 = arith.constant 0.000000e+00 : f32
    %17 = vector.broadcast %cst_4 : f32 to vector<32x7xf32>
    %18 = arith.cmpf one, %16, %17 : vector<32x7xf32>
    %19 = arith.extui %18 : vector<32x7xi1> to vector<32x7xi32>
    %20 = arith.sitofp %19 : vector<32x7xi32> to vector<32x7xf32>
    %cst_5 = arith.constant 1.000000e+00 : f32
    %21 = vector.broadcast %cst_5 : f32 to vector<32x7xf32>
    %22 = arith.subf %20, %21 : vector<32x7xf32>
    %cst_6 = arith.constant 9.999000e+03 : f32
    %23 = vector.broadcast %cst_6 : f32 to vector<32x7xf32>
    %24 = arith.mulf %22, %23 : vector<32x7xf32>
    %25 = arith.addf %16, %24 : vector<32x7xf32>
    %cst_7 = arith.constant dense<0xFF800000> : vector<32xf32>
    %26 = vector.multi_reduction <maximumf>, %25, %cst_7 [1] : vector<32x7xf32> to vector<32xf32>
    %27 = vector.shape_cast %26 : vector<32xf32> to vector<32x1xf32>
    %28 = vector.broadcast %27 : vector<32x1xf32> to vector<32x7xf32>
    %29 = arith.subf %25, %28 : vector<32x7xf32>
    %30 = math.exp %29 : vector<32x7xf32>
    %cst_8 = arith.constant dense<0.000000e+00> : vector<32xf32>
    %31 = vector.multi_reduction <add>, %30, %cst_8 [1] : vector<32x7xf32> to vector<32xf32>
    %32 = vector.shape_cast %31 : vector<32xf32> to vector<32x1xf32>
    %33 = vector.broadcast %32 : vector<32x1xf32> to vector<32x7xf32>
    %34 = arith.divf %30, %33 : vector<32x7xf32>
    %c0_9 = arith.constant 0 : index
    %c0_10 = arith.constant 0 : index
    %35 = vector.load %arg3[%c0_9, %c0_10] : memref<1x7xf32, #tpu.memory_space<vmem>>, vector<1x7xf32>
    %36 = vector.broadcast %35 : vector<1x7xf32> to vector<32x7xf32>
    %37 = arith.mulf %34, %36 : vector<32x7xf32>
    %38 = vector.shape_cast %37 : vector<32x7xf32> to vector<32x7x1xf32>
    %39 = vector.broadcast %38 : vector<32x7x1xf32> to vector<32x7x32xf32>
    %40 = arith.mulf %39, %12 : vector<32x7x32xf32>
    %cst_11 = arith.constant dense<0.000000e+00> : vector<32x32xf32>
    %41 = vector.multi_reduction <add>, %40, %cst_11 [1] : vector<32x7x32xf32> to vector<32x32xf32>
    %42 = tpu.concatenate %11, %41 in 1 : vector<32x32xf32>, vector<32x32xf32> -> vector<32x64xf32>
    %c0_12 = arith.constant 0 : index
    %c0_13 = arith.constant 0 : index
    %43 = vector.load %arg4[%c0_12, %c0_13] : memref<64x384xf32, #tpu.memory_space<vmem>>, vector<64x384xf32>
    %cst_14 = arith.constant dense<0.000000e+00> : vector<32x384xf32>
    %44 = tpu.matmul %42, %43, %cst_14 {dimension_numbers = #tpu.dot_dimension_numbers<[1], [0], [0], [1], [0, 0, 1, 1], [], []>} : vector<32x64xf32>, vector<64x384xf32>, vector<32x384xf32> -> vector<32x384xf32>
    %c0_15 = arith.constant 0 : index
    %c0_16 = arith.constant 0 : index
    %45 = vector.load %arg5[%c0_15, %c0_16] : memref<1x384xf32, #tpu.memory_space<vmem>>, vector<1x384xf32>
    %46 = vector.broadcast %45 : vector<1x384xf32> to vector<32x384xf32>
    %47 = arith.addf %44, %46 : vector<32x384xf32>
    %48 = vector.extract_strided_slice %47 {offsets = [0, 0], sizes = [16, 384], strides = [1, 1]} : vector<32x384xf32> to vector<16x384xf32>
    %49 = vector.extract_strided_slice %47 {offsets = [16, 0], sizes = [16, 384], strides = [1, 1]} : vector<32x384xf32> to vector<16x384xf32>
    %50 = arith.mulf %48, %49 : vector<16x384xf32>
    %cst_17 = arith.constant dense<0.000000e+00> : vector<16xf32>
    %51 = vector.multi_reduction <add>, %50, %cst_17 [1] : vector<16x384xf32> to vector<16xf32>
    %52 = vector.shape_cast %51 : vector<16xf32> to vector<16x1xf32>
    %53 = arith.mulf %48, %48 : vector<16x384xf32>
    %cst_18 = arith.constant dense<0.000000e+00> : vector<16xf32>
    %54 = vector.multi_reduction <add>, %53, %cst_18 [1] : vector<16x384xf32> to vector<16xf32>
    %55 = vector.shape_cast %54 : vector<16xf32> to vector<16x1xf32>
    %56 = arith.mulf %49, %49 : vector<16x384xf32>
    %cst_19 = arith.constant dense<0.000000e+00> : vector<16xf32>
    %57 = vector.multi_reduction <add>, %56, %cst_19 [1] : vector<16x384xf32> to vector<16xf32>
    %58 = vector.shape_cast %57 : vector<16xf32> to vector<16x1xf32>
    %cst_20 = arith.constant 1.000000e-16 : f32
    %59 = vector.broadcast %cst_20 : f32 to vector<16x1xf32>
    %60 = arith.maximumf %55, %59 : vector<16x1xf32>
    %61 = math.rsqrt %60 : vector<16x1xf32>
    %62 = arith.mulf %52, %61 : vector<16x1xf32>
    %cst_21 = arith.constant 1.000000e-16 : f32
    %63 = vector.broadcast %cst_21 : f32 to vector<16x1xf32>
    %64 = arith.maximumf %58, %63 : vector<16x1xf32>
    %65 = math.rsqrt %64 : vector<16x1xf32>
    %66 = arith.mulf %62, %65 : vector<16x1xf32>
    %c0_22 = arith.constant 0 : index
    %c0_23 = arith.constant 0 : index
    %67 = vector.load %arg6[%c0_22, %c0_23] : memref<16x1xf32, #tpu.memory_space<vmem>>, vector<16x1xf32>
    tpu.vector_store %arg6[%c0_22, %c0_23], %66 {strides = array<i32>} : memref<16x1xf32, #tpu.memory_space<vmem>>, vector<16x1xf32>,
    return
  }
  func.func @transform_0(%arg0: i32) -> (i32, i32) {
    %c0_i32 = arith.constant 0 : i32
    %c0_i32_0 = arith.constant 0 : i32
    return %arg0, %c0_i32 : i32, i32
  }
  func.func @transform_1(%arg0: i32) -> (i32, i32) {
    %c0_i32 = arith.constant 0 : i32
    %c0_i32_0 = arith.constant 0 : i32
    %c0_i32_1 = arith.constant 0 : i32
    return %c0_i32, %c0_i32_0 : i32, i32
  }
  func.func @transform_2(%arg0: i32) -> (i32, i32) {
    %c0_i32 = arith.constant 0 : i32
    %c0_i32_0 = arith.constant 0 : i32
    %c0_i32_1 = arith.constant 0 : i32
    return %c0_i32, %c0_i32_0 : i32, i32
  }
  func.func @transform_3(%arg0: i32) -> (i32, i32) {
    %c0_i32 = arith.constant 0 : i32
    %c0_i32_0 = arith.constant 0 : i32
    %c0_i32_1 = arith.constant 0 : i32
    return %c0_i32, %c0_i32_0 : i32, i32
  }
  func.func @transform_4(%arg0: i32) -> (i32, i32) {
    %c0_i32 = arith.constant 0 : i32
    %c0_i32_0 = arith.constant 0 : i32
    %c0_i32_1 = arith.constant 0 : i32
    return %c0_i32, %c0_i32_0 : i32, i32
  }
  func.func @transform_5(%arg0: i32) -> (i32, i32) {
    %c0_i32 = arith.constant 0 : i32
    %c0_i32_0 = arith.constant 0 : i32
    return %arg0, %c0_i32 : i32, i32
  }
}

</mosaic_0001>

<bundles_post_ra>
// kernel: siamese_forward.1
= control target key start
LH: loop header
LB: loop body
LE: loop exit
PB: predicated region body
PF: predicated region fallthrough
CT: control target
= control target key end

     0   :  { %s3792_s18 = smov 0   ;;  %s5099_s0 = inlined_call_operand.vmem [shape: s32[512,1], index: 0, kind: input, shape index: {}]   ;;  %s5100_s1 = inlined_call_operand.vmem [shape: f32[64,32], index: 1, kind: input, shape index: {}]   ;;  %s5101_s2 = inlined_call_operand.vmem [shape: f32[1,7], index: 2, kind: input, shape index: {}]   ;;  %s5102_s3 = inlined_call_operand.vmem [shape: f32[64,384], index: 3, kind: input, shape index: {}]   ;;  %s5103_s4 = inlined_call_operand.vmem [shape: f32[1,384], index: 4, kind: input, shape index: {}]   ;;  %s5104_s5 = inlined_call_operand.vmem [shape: f32[32,1], index: 5, kind: output, shape index: {}]  }
   0x1 LB: > { %s3300_s19 = sadd.s32 4294967295, %s3757_s18   ;;  %p3304_p0 = scmp.ge.s32.totalorder %s3757_s18, 1  ;;  %s3757_s18 = sphi %s3792_s18, %s15_s18  }
   0x2   : > { %p188_p1 = scmp.lt.s32.totalorder %s3757_s18, 3 }
   0x4   : > { %p189_p2 = pnand %p3304_p0, %p188_p1 }
   0x6   : > { %192 = sbr.rel (%p189_p2) target bundleno = 1760 (0x6e0), region = 40 }
   0xb   : > { %s3305_s20 = sshll.u32 %s3300_s19, 5  ;;  %v461_v0 = vld [vmem:[%s5100_s1 + $0x38] sm:$0xff]  ;;  %v3759_v1 = vmov 0   ;;  %v460_v2 = vld [vmem:[%s5100_s1 + $0x30] sm:$0xff]  ;;  %v459_v3 = vld [vmem:[%s5100_s1 + $0x28] sm:$0xff]  ;;  %v260_v41 = vlaneseq  ;;  %vm462_vm0 = vcmask 523264  }
   0xc   : > { %3614 = vset.pattern.permute.xlu1 %v3759_v1  ;;  %3613 = vset.pattern.permute.xlu0 %v3759_v1  ;;  %p217_p3 = scmp.lt.s32.totalorder %s3305_s20, 63  ;;  %v458_v4 = vld [vmem:[%s5100_s1 + $0x20] sm:$0xff]  ;;  %v457_v7 = vld [vmem:[%s5100_s1 + $0x18] sm:$0xff]  ;;  %v456_v10 = vld [vmem:[%s5100_s1 + $0x10] sm:$0xff]  ;;  %v5141_v45 = vmov 0.0   ;;  %s3761_s29 = smov 32  }
   0xd   : > { %3500 = vmatprep.subr.mxu0 %v461_v0  ;;  %3586 = vmatprep.subr.mxu1 %v461_v0  ;;  %v455_v13 = vld [vmem:[%s5100_s1 + $0x8] sm:$0xff]  ;;  %v454_v16 = vld [vmem:[%s5100_s1] sm:$0xff]  ;;  %v3864_v42 = vand.u32 127, %v260_v41  ;;  %s3307_s25 = sshll.u32 %s3300_s19, 1 }
   0xe   : > { %s5264_s20 = smov (!%p217_p3, %s3305_s20), 63  ;;  %3501 = vmatpush3.msra.mxu0 %v461_v0  ;;  %3594 = vmatpush3.msra.mxu1 %v461_v0  ;;  %p223_p4 = scmp.lt.s32.totalorder %s3307_s25, 3 }
   0xf   : > { %3502 = vmatprep.subr.mxu0 %v460_v2  ;;  %3587 = vmatprep.subr.mxu1 %v460_v2  ;;  %s3306_s27 = sshll.u32 %s5264_s20, 3 }
  0x10   : > { %3503 = vmatpush3.msra.mxu0 %v460_v2  ;;  %3595 = vmatpush3.msra.mxu1 %v460_v2  ;;  %s3814_s30 = scalar_lea.vmem %s5099_s0, %s3306_s27  ;;  %s5266_s25 = smov (!%p223_p4, %s3307_s25), 3 }
  0x11   : > { %3504 = vmatprep.subr.mxu0 %v459_v3  ;;  %3588 = vmatprep.subr.mxu1 %v459_v3  ;;  %v230_v5 = vld [vmem:[%s3814_s30 + $0x10] sm:$0xff]  ;;  %v228_v6 = vld [vmem:[%s3814_s30] sm:$0xff]  ;;  %v231_v8 = vld [vmem:[%s3814_s30 + $0x18] sm:$0xff]  ;;  %s3308_s26 = sshll.u32 %s5266_s25, 3 }
  0x12   : > { %3505 = vmatpush3.msra.mxu0 %v459_v3  ;;  %3596 = vmatpush3.msra.mxu1 %v459_v3  ;;  %v229_v9 = vld [vmem:[%s3814_s30 + $0x8] sm:$0xff]  ;;  %v232_v12 = vld [vmem:[%s3814_s30 + $0x20] sm:$0xff]  ;;  %v235_v14 = vld [vmem:[%s3814_s30 + $0x38] sm:$0xff] }
  0x13   : > { %269 = vperm.xlu1 %3614, %v230_v5   ;;  %263 = vperm.xlu0 %3613, %v228_v6   ;;  %v233_v11 = vld [vmem:[%s3814_s30 + $0x28] sm:$0xff]  ;;  %v234_v15 = vld [vmem:[%s3814_s30 + $0x30] sm:$0xff]  ;;  %v236_v18 = vld [vmem:[%s3814_s30 + $0x40] sm:$0xff] }
  0x14   : > { %3506 = vmatprep.subr.mxu0 %v458_v4  ;;  %3589 = vmatprep.subr.mxu1 %v458_v4  ;;  %v237_v17 = vld [vmem:[%s3814_s30 + $0x48] sm:$0xff]  ;;  %v239_v19 = vld [vmem:[%s3814_s30 + $0x58] sm:$0xff]  ;;  %v238_v20 = vld [vmem:[%s3814_s30 + $0x50] sm:$0xff] }
  0x15   : > { %3507 = vmatpush3.msra.mxu0 %v458_v4  ;;  %3597 = vmatpush3.msra.mxu1 %v458_v4  ;;  %v241_v21 = vld [vmem:[%s3814_s30 + $0x68] sm:$0xff]  ;;  %v240_v22 = vld [vmem:[%s3814_s30 + $0x60] sm:$0xff]  ;;  %v243_v23 = vld [vmem:[%s3814_s30 + $0x78] sm:$0xff] }
  0x16   : > { %3508 = vmatprep.subr.mxu0 %v457_v7  ;;  %3590 = vmatprep.subr.mxu1 %v457_v7  ;;  %v242_v24 = vld [vmem:[%s3814_s30 + $0x70] sm:$0xff]  ;;  %v251_v25 = vld [vmem:[%s3814_s30 + $0xb8] sm:$0xff]  ;;  %v245_v27 = vld [vmem:[%s3814_s30 + $0x88] sm:$0xff] }
  0x17   : > { %272 = vperm.xlu1 %3614, %v231_v8   ;;  %266 = vperm.xlu0 %3613, %v229_v9   ;;  %v250_v26 = vld [vmem:[%s3814_s30 + $0xb0] sm:$0xff]  ;;  %v244_v28 = vld [vmem:[%s3814_s30 + $0x80] sm:$0xff]  ;;  %v253_v29 = vld [vmem:[%s3814_s30 + $0xc8] sm:$0xff] }
  0x18   : > { %3509 = vmatpush3.msra.mxu0 %v457_v7  ;;  %3598 = vmatpush3.msra.mxu1 %v457_v7  ;;  %v252_v30 = vld [vmem:[%s3814_s30 + $0xc0] sm:$0xff]  ;;  %v247_v31 = vld [vmem:[%s3814_s30 + $0x98] sm:$0xff]  ;;  %v246_v32 = vld [vmem:[%s3814_s30 + $0x90] sm:$0xff] }
  0x19   : > { %3510 = vmatprep.subr.mxu0 %v456_v10  ;;  %3591 = vmatprep.subr.mxu1 %v456_v10  ;;  %v255_v33 = vld [vmem:[%s3814_s30 + $0xd8] sm:$0xff]  ;;  %v254_v34 = vld [vmem:[%s3814_s30 + $0xd0] sm:$0xff]  ;;  %v249_v35 = vld [vmem:[%s3814_s30 + $0xa8] sm:$0xff] }
  0x1a   : > { %3511 = vmatpush3.msra.mxu0 %v456_v10  ;;  %3599 = vmatpush3.msra.mxu1 %v456_v10  ;;  %v248_v36 = vld [vmem:[%s3814_s30 + $0xa0] sm:$0xff]  ;;  %v257_v37 = vld [vmem:[%s3814_s30 + $0xe8] sm:$0xff]  ;;  %v259_v39 = vld [vmem:[%s3814_s30 + $0xf8] sm:$0xff] }
  0x1b   : > { %278 = vperm.xlu1 %3614, %v233_v11   ;;  %275 = vperm.xlu0 %3613, %v232_v12   ;;  %v256_v38 = vld [vmem:[%s3814_s30 + $0xe0] sm:$0xff]  ;;  %v258_v40 = vld [vmem:[%s3814_s30 + $0xf0] sm:$0xff] }
  0x1c   : > { %3512 = vmatprep.subr.mxu0 %v455_v13  ;;  %3592 = vmatprep.subr.mxu1 %v455_v13 }
  0x1d   : > { %3513 = vmatpush3.msra.mxu0 %v455_v13  ;;  %3600 = vmatpush3.msra.mxu1 %v455_v13 }
  0x1e   : > { %3514 = vmatprep.subr.mxu0 %v454_v16  ;;  %3593 = vmatprep.subr.mxu1 %v454_v16 }
  0x1f   : > { %284 = vperm.xlu1 %3614, %v235_v14   ;;  %281 = vperm.xlu0 %3613, %v234_v15  }
  0x20   : > { %3515 = vmatpush3.msra.mxu0 %v454_v16  ;;  %3601 = vmatpush3.msra.mxu1 %v454_v16 }
  0x23   : > { %290 = vperm.xlu1 %3614, %v237_v17   ;;  %287 = vperm.xlu0 %3613, %v236_v18  }
  0x27   : > { %296 = vperm.xlu1 %3614, %v239_v19   ;;  %293 = vperm.xlu0 %3613, %v238_v20  }
  0x2b   : > { %302 = vperm.xlu1 %3614, %v241_v21   ;;  %299 = vperm.xlu0 %3613, %v240_v22  }
  0x2f   : > { %308 = vperm.xlu1 %3614, %v243_v23   ;;  %305 = vperm.xlu0 %3613, %v242_v24  }
  0x33   : > { %332 = vperm.xlu1 %3614, %v251_v25   ;;  %329 = vperm.xlu0 %3613, %v250_v26  }
  0x37   : > { %314 = vperm.xlu1 %3614, %v245_v27   ;;  %311 = vperm.xlu0 %3613, %v244_v28  }
  0x3b   : > { %338 = vperm.xlu1 %3614, %v253_v29   ;;  %335 = vperm.xlu0 %3613, %v252_v30  }
  0x3f   : > { %320 = vperm.xlu1 %3614, %v247_v31   ;;  %317 = vperm.xlu0 %3613, %v246_v32  }
  0x43   : > { %344 = vperm.xlu1 %3614, %v255_v33   ;;  %341 = vperm.xlu0 %3613, %v254_v34  }
  0x47   : > { %326 = vperm.xlu1 %3614, %v249_v35   ;;  %323 = vperm.xlu0 %3613, %v248_v36  }
  0x4b   : > { %350 = vperm.xlu1 %3614, %v257_v37   ;;  %347 = vperm.xlu0 %3613, %v256_v38  }
  0x4f   : > { %356 = vperm.xlu1 %3614, %v259_v39   ;;  %353 = vperm.xlu0 %3613, %v258_v40  }
  0x8e   : > { %v270_v43 = vpop.permute.xlu1 %269  ;;  %v264_v44 = vpop.permute.xlu0 %263 }
  0x8f   : > { %vm358_vm1 = vcmp.eq.s32.totalorder %v264_v44, %v3864_v42  ;;  %vm360_vm2 = vcmp.eq.s32.totalorder %v270_v43, %v3864_v42 }
  0x90   : > { %v3309_v46 = vsel %vm358_vm1, 1.0, %v5141_v45  ;;  %v3311_v50 = vsel %vm360_vm2, 1.0, %v5141_v45 }
  0x91   : > { %3516 = vmatprep.mubr.msk.f32.mxu0 %vm462_vm0, %v3309_v46 }
  0x92   : > { %v273_v47 = vpop.permute.xlu1 %272  ;;  %v267_v48 = vpop.permute.xlu0 %266 }
  0x93   : > { %vm359_vm3 = vcmp.eq.s32.totalorder %v267_v48, %v3864_v42  ;;  %vm361_vm4 = vcmp.eq.s32.totalorder %v273_v47, %v3864_v42  ;;  %v3964_v47 = vshrl.u32 %v260_v41, 7 }
  0x94   : > { %v3310_v49 = vsel %vm359_vm3, 1.0, %v5141_v45  ;;  %v3312_v53 = vsel %vm361_vm4, 1.0, %v5141_v45 }
  0x95   : > { %3517 = vmatmul.mubr.msk.f32.vlgmr.msra.gmra.mxu0 %vm462_vm0, %v3310_v49  ;;  %v3967_v48 = vsub.s32 0, %v3964_v47 }
  0x96   : > { %v279_v51 = vpop.permute.xlu1 %278  ;;  %3519 = vmatprep.mubr.msk.f32.mxu0 %vm462_vm0, %v3311_v50  ;;  %v276_v52 = vpop.permute.xlu0 %275 }
  0x97   : > { %vm362_vm5 = vcmp.eq.s32.totalorder %v276_v52, %v3864_v42  ;;  %vm363_vm6 = vcmp.eq.s32.totalorder %v279_v51, %v3864_v42  ;;  %5175 = vst [vmem:[#allocation2_spill] sm:$0xff] %v3967_v48 }
  0x98   : > { %v3313_v54 = vsel %vm362_vm5, 1.0, %v5141_v45  ;;  %v3314_v57 = vsel %vm363_vm6, 1.0, %v5141_v45 }
  0x99   : > { %3520 = vmatmul.mubr.msk.f32.gmra.mxu0 %vm462_vm0, %v3312_v53 }
  0x9a   : > { %v285_v55 = vpop.permute.xlu1 %284  ;;  %3522 = vmatprep.mubr.msk.f32.mxu0 %vm462_vm0, %v3313_v54  ;;  %v282_v56 = vpop.permute.xlu0 %281 }
  0x9b   : > { %vm364_vm7 = vcmp.eq.s32.totalorder %v282_v56, %v3864_v42  ;;  %vm365_vm8 = vcmp.eq.s32.totalorder %v285_v55, %v3864_v42 }
  0x9c   : > { %v3315_v58 = vsel %vm364_vm7, 1.0, %v5141_v45  ;;  %v3316_v61 = vsel %vm365_vm8, 1.0, %v5141_v45 }
  0x9d   : > { %3523 = vmatmul.mubr.msk.f32.gmra.mxu0 %vm462_vm0, %v3314_v57 }
  0x9e   : > { %v291_v59 = vpop.permute.xlu1 %290  ;;  %3525 = vmatprep.mubr.msk.f32.mxu0 %vm462_vm0, %v3315_v58  ;;  %v288_v60 = vpop.permute.xlu0 %287 }
  0x9f   : > { %vm366_vm9 = vcmp.eq.s32.totalorder %v288_v60, %v3864_v42  ;;  %vm367_vm10 = vcmp.eq.s32.totalorder %v291_v59, %v3864_v42 }
  0xa0   : > { %v3317_v62 = vsel %vm366_vm9, 1.0, %v5141_v45  ;;  %v3318_v1 = vsel %vm367_vm10, 1.0, %v5141_v45 }
  0xa1   : > { %3526 = vmatmul.mubr.msk.f32.gmra.mxu0 %vm462_vm0, %v3316_v61 }
  0xa2   : > { %v297_v63 = vpop.permute.xlu1 %296  ;;  %3528 = vmatprep.mubr.msk.f32.mxu0 %vm462_vm0, %v3317_v62  ;;  %v294_v0 = vpop.permute.xlu0 %293 }
  0xa3   : > { %vm368_vm11 = vcmp.eq.s32.totalorder %v294_v0, %v3864_v42  ;;  %vm369_vm12 = vcmp.eq.s32.totalorder %v297_v63, %v3864_v42 }
  0xa4   : > { %v3319_v2 = vsel %vm368_vm11, 1.0, %v5141_v45  ;;  %v3320_v5 = vsel %vm369_vm12, 1.0, %v5141_v45 }
  0xa5   : > { %3529 = vmatmul.mubr.msk.f32.gmra.mxu0 %vm462_vm0, %v3318_v1 }
  0xa6   : > { %v303_v3 = vpop.permute.xlu1 %302  ;;  %3531 = vmatprep.mubr.msk.f32.mxu0 %vm462_vm0, %v3319_v2  ;;  %v300_v4 = vpop.permute.xlu0 %299 }
  0xa7   : > { %vm370_vm13 = vcmp.eq.s32.totalorder %v300_v4, %v3864_v42  ;;  %vm371_vm14 = vcmp.eq.s32.totalorder %v303_v3, %v3864_v42 }
  0xa8   : > { %v3321_v6 = vsel %vm370_vm13, 1.0, %v5141_v45  ;;  %v3322_v9 = vsel %vm371_vm14, 1.0, %v5141_v45 }
  0xa9   : > { %3532 = vmatmul.mubr.msk.f32.gmra.mxu0 %vm462_vm0, %v3320_v5 }
  0xaa   : > { %v309_v7 = vpop.permute.xlu1 %308  ;;  %3534 = vmatprep.mubr.msk.f32.mxu0 %vm462_vm0, %v3321_v6  ;;  %v306_v8 = vpop.permute.xlu0 %305 }
  0xab   : > { %vm372_vm15 = vcmp.eq.s32.totalorder %v306_v8, %v3864_v42  ;;  %vm373_vm1 = vcmp.eq.s32.totalorder %v309_v7, %v3864_v42 }
  0xac   : > { %v3323_v10 = vsel %vm372_vm15, 1.0, %v5141_v45  ;;  %v3324_v13 = vsel %vm373_vm1, 1.0, %v5141_v45 }
  0xad   : > { %3535 = vmatmul.mubr.msk.f32.gmra.mxu0 %vm462_vm0, %v3322_v9 }
  0xae   : > { %v333_v11 = vpop.permute.xlu1 %332  ;;  %3537 = vmatprep.mubr.msk.f32.mxu0 %vm462_vm0, %v3323_v10  ;;  %v330_v12 = vpop.permute.xlu0 %329 }
  0xaf   : > { %vm381_vm2 = vcmp.eq.s32.totalorder %v333_v11, %v3864_v42  ;;  %vm380_vm3 = vcmp.eq.s32.totalorder %v330_v12, %v3864_v42 }
  0xb0   : > { %v3332_v14 = vsel %vm381_vm2, 1.0, %v5141_v45  ;;  %v3331_v15 = vsel %vm380_vm3, 1.0, %v5141_v45  ;;  %vm944_vm3 = vcmask 261121  }
  0xb1   : > { %3538 = vmatmul.mubr.msk.f32.gmra.mxu0 %vm462_vm0, %v3324_v13  ;;  %3549 = vmatprep.mubr.msk.f32.mxu1 %vm462_vm0, %v3331_v15 }
  0xb2   : > { %v315_v16 = vpop.permute.xlu1 %314  ;;  %3550 = vmatmul.mubr.msk.f32.vlgmr.msra.gmra.mxu1 %vm462_vm0, %v3332_v14  ;;  %v312_v17 = vpop.permute.xlu0 %311 }
  0xb3   : > { %vm375_vm4 = vcmp.eq.s32.totalorder %v315_v16, %v3864_v42  ;;  %vm374_vm5 = vcmp.eq.s32.totalorder %v312_v17, %v3864_v42 }
  0xb4   : > { %v3326_v18 = vsel %vm375_vm4, 1.0, %v5141_v45  ;;  %v3325_v19 = vsel %vm374_vm5, 1.0, %v5141_v45 }
  0xb5   : > { %3540 = vmatprep.mubr.msk.f32.mxu0 %vm462_vm0, %v3325_v19 }
  0xb6   : > { %v339_v20 = vpop.permute.xlu1 %338  ;;  %3541 = vmatmul.mubr.msk.f32.gmra.mxu0 %vm462_vm0, %v3326_v18  ;;  %v336_v21 = vpop.permute.xlu0 %335 }
  0xb7   : > { %vm383_vm6 = vcmp.eq.s32.totalorder %v339_v20, %v3864_v42  ;;  %vm382_vm7 = vcmp.eq.s32.totalorder %v336_v21, %v3864_v42 }
  0xb8   : > { %v3334_v22 = vsel %vm383_vm6, 1.0, %v5141_v45  ;;  %v3333_v23 = vsel %vm382_vm7, 1.0, %v5141_v45 }
  0xb9   : > { %3552 = vmatprep.mubr.msk.f32.mxu1 %vm462_vm0, %v3333_v23 }
  0xba   : > { %v321_v24 = vpop.permute.xlu1 %320  ;;  %3553 = vmatmul.mubr.msk.f32.gmra.mxu1 %vm462_vm0, %v3334_v22  ;;  %v318_v25 = vpop.permute.xlu0 %317 }
  0xbb   : > { %vm377_vm8 = vcmp.eq.s32.totalorder %v321_v24, %v3864_v42  ;;  %vm376_vm9 = vcmp.eq.s32.totalorder %v318_v25, %v3864_v42 }
  0xbc   : > { %v3328_v26 = vsel %vm377_vm8, 1.0, %v5141_v45  ;;  %v3327_v27 = vsel %vm376_vm9, 1.0, %v5141_v45 }
  0xbd   : > { %3543 = vmatprep.mubr.msk.f32.mxu0 %vm462_vm0, %v3327_v27 }
  0xbe   : > { %v345_v28 = vpop.permute.xlu1 %344  ;;  %3544 = vmatmul.mubr.msk.f32.gmra.mxu0 %vm462_vm0, %v3328_v26  ;;  %v342_v29 = vpop.permute.xlu0 %341 }
  0xbf   : > { %vm385_vm10 = vcmp.eq.s32.totalorder %v345_v28, %v3864_v42  ;;  %vm384_vm11 = vcmp.eq.s32.totalorder %v342_v29, %v3864_v42 }
  0xc0   : > { %v3336_v30 = vsel %vm385_vm10, 1.0, %v5141_v45  ;;  %v3335_v31 = vsel %vm384_vm11, 1.0, %v5141_v45  ;;  %vm1393_vm11 = vcmask 1041409  }
  0xc1   : > { %3555 = vmatprep.mubr.msk.f32.mxu1 %vm462_vm0, %v3335_v31 }
  0xc2   : > { %v327_v32 = vpop.permute.xlu1 %326  ;;  %3556 = vmatmul.mubr.msk.f32.gmra.mxu1 %vm462_vm0, %v3336_v30  ;;  %v324_v33 = vpop.permute.xlu0 %323 }
  0xc3   : > { %vm379_vm12 = vcmp.eq.s32.totalorder %v327_v32, %v3864_v42  ;;  %vm378_vm13 = vcmp.eq.s32.totalorder %v324_v33, %v3864_v42 }
  0xc4   : > { %v3330_v34 = vsel %vm379_vm12, 1.0, %v5141_v45  ;;  %v3329_v35 = vsel %vm378_vm13, 1.0, %v5141_v45  ;;  %vm1395_vm12 = vcmask 1042434  }
  0xc5   : > { %3546 = vmatprep.mubr.msk.f32.mxu0 %vm462_vm0, %v3329_v35 }
  0xc6   : > { %v351_v36 = vpop.permute.xlu1 %350  ;;  %3547 = vmatmul.mubr.msk.f32.gmra.mxu0 %vm462_vm0, %v3330_v34  ;;  %v348_v37 = vpop.permute.xlu0 %347 }
  0xc7   : > { %vm387_vm14 = vcmp.eq.s32.totalorder %v351_v36, %v3864_v42  ;;  %vm386_vm15 = vcmp.eq.s32.totalorder %v348_v37, %v3864_v42 }
  0xc8   : > { %v3338_v38 = vsel %vm387_vm14, 1.0, %v5141_v45  ;;  %v3337_v39 = vsel %vm386_vm15, 1.0, %v5141_v45 }
  0xc9   : > { %3558 = vmatprep.mubr.msk.f32.mxu1 %vm462_vm0, %v3337_v39 }
  0xca   : > { %v357_v40 = vpop.permute.xlu1 %356  ;;  %3559 = vmatmul.mubr.msk.f32.gmra.mxu1 %vm462_vm0, %v3338_v38  ;;  %v354_v43 = vpop.permute.xlu0 %353 }
  0xcb   : > { %vm389_vm1 = vcmp.eq.s32.totalorder %v357_v40, %v3864_v42  ;;  %vm388_vm2 = vcmp.eq.s32.totalorder %v354_v43, %v3864_v42 }
  0xcc   : > { %v3340_v44 = vsel %vm389_vm1, 1.0, %v5141_v45  ;;  %v3339_v46 = vsel %vm388_vm2, 1.0, %v5141_v45  ;;  %vm1397_vm1 = vcmask 1043459   ;;  %vm1399_vm2 = vcmask 1044484  }
  0xcd   : > { %3561 = vmatprep.mubr.msk.f32.mxu1 %vm462_vm0, %v3339_v46 }
  0xce   : > { %3562 = vmatmul.mubr.msk.f32.gmra.mxu1 %vm462_vm0, %v3340_v44 }
  0xcf   : > { %3077 = vmatprep.mubr.f32.mxu1 %v5141_v45 }
 0x155   : > { %v3969_v49 = vpop.f32.mrf.mxu0 }
 0x156   : > { %5176 = vst [vmem:[#allocation3_spill] sm:$0xff] %v3969_v49  ;;  %v791_v50 = vrot.slane %v3969_v49, %v3967_v48 }
 0x157   : > { %v3973_v51 = vpop.f32.mrf.mxu0 }
 0x158   : > { %5177 = vst [vmem:[#allocation4_spill] sm:$0xff] %v3973_v51  ;;  %v913_v52 = vmul.f32 %v3969_v49, %v791_v50  ;;  %v787_v53 = vrot.slane %v3973_v51, %v3967_v48 }
 0x159   : > { %v3978_v54 = vpop.f32.mrf.mxu0 }
 0x15a   : > { %5178 = vst [vmem:[#allocation5_spill] sm:$0xff] %v3978_v54  ;;  %v948_v41 = vsel %vm944_vm3, %v913_v52, 0.0  ;;  %v912_v55 = vmul.f32 %v787_v53, %v3973_v51  ;;  %v799_v56 = vrot.slane %v3978_v54, %v3967_v48 }
 0x15b   : > { %949 = vadd.xlane.f32.xlu1 %v948_v41  ;;  %v3984_v57 = vpop.f32.mrf.mxu0 }
 0x15c   : > { %5179 = vst [vmem:[#allocation6_spill] sm:$0xff] %v3984_v57  ;;  %v945_v58 = vsel %vm944_vm3, %v912_v55, 0.0  ;;  %v915_v59 = vmul.f32 %v3978_v54, %v799_v56  ;;  %v795_v16 = vrot.slane %v3984_v57, %v3967_v48 }
 0x15d   : > { %946 = vadd.xlane.f32.xlu0 %v945_v58  ;;  %v3988_v60 = vpop.f32.mrf.mxu0 }
 0x15e   : > { %5180 = vst [vmem:[#allocation7_spill] sm:$0xff] %v3988_v60  ;;  %v954_v62 = vsel %vm944_vm3, %v915_v59, 0.0  ;;  %v914_v24 = vmul.f32 %v795_v16, %v3984_v57  ;;  %v807_v25 = vrot.slane %v3988_v60, %v3967_v48 }
 0x15f   : > { %v3990_v61 = vpop.f32.mrf.mxu0 }
 0x160   : > { %5181 = vst [vmem:[#allocation8_spill] sm:$0xff] %v3990_v61  ;;  %v803_v20 = vrot.slane %v3990_v61, %v3967_v48  ;;  %v951_v31 = vsel %vm944_vm3, %v914_v24, 0.0  ;;  %v917_v32 = vmul.f32 %v3988_v60, %v807_v25 }
 0x161   : > { %955 = vadd.xlane.f32.xlu0 %v954_v62  ;;  %v3993_v63 = vpop.f32.mrf.mxu0 }
 0x162   : > { %5182 = vst [vmem:[#allocation9_spill] sm:$0xff] %v3993_v63  ;;  %v916_v27 = vmul.f32 %v803_v20, %v3990_v61  ;;  %v815_v28 = vrot.slane %v3993_v63, %v3967_v48  ;;  %v960_v39 = vsel %vm944_vm3, %v917_v32, 0.0 }
 0x163   : > { %v3995_v0 = vpop.f32.mrf.mxu0 }
 0x164   : > { %5183 = vst [vmem:[#allocation10_spill] sm:$0xff] %v3995_v0  ;;  %v957_v35 = vsel %vm944_vm3, %v916_v27, 0.0  ;;  %v919_v36 = vmul.f32 %v3993_v63, %v815_v28  ;;  %v811_v37 = vrot.slane %v3995_v0, %v3967_v48 }
 0x165   : > { %v3997_v1 = vpop.f32.mrf.mxu0 }
 0x166   : > { %5184 = vst [vmem:[#allocation11_spill] sm:$0xff] %v3997_v1  ;;  %v966_v44 = vsel %vm944_vm3, %v919_v36, 0.0  ;;  %v918_v46 = vmul.f32 %v811_v37, %v3995_v0  ;;  %v823_v55 = vrot.slane %v3997_v1, %v3967_v48 }
 0x167   : > { %v3999_v2 = vpop.f32.mrf.mxu0 }
 0x168   : > { %5185 = vst [vmem:[#allocation12_spill] sm:$0xff] %v3999_v2  ;;  %v819_v50 = vrot.slane %v3999_v2, %v3967_v48  ;;  %v963_v56 = vsel %vm944_vm3, %v918_v46, 0.0 }
 0x169   : > { %v4001_v3 = vpop.f32.mrf.mxu0 }
 0x16a   : > { %5186 = vst [vmem:[#allocation13_spill] sm:$0xff] %v4001_v3  ;;  %v920_v58 = vmul.f32 %v819_v50, %v3999_v2 }
 0x16b   : > { %v4012_v9 = vpop.f32.mrf.mxu0 }
 0x16c   : > { %5189 = vst [vmem:[#allocation16_spill] sm:$0xff] %v4012_v9 }
 0x16d   : > { %v4016_v12 = vpop.f32.mrf.mxu0 }
 0x16e   : > { %5190 = vst [vmem:[#allocation17_spill] sm:$0xff] %v4016_v12 }
 0x16f   : > { %v4032_v21 = vpop.f32.mrf.mxu0 }
 0x170   : > { %5193 = vst [vmem:[#allocation20_spill] sm:$0xff] %v4032_v21  ;;  %v835_v59 = vrot.slane %v4032_v21, %v3967_v48 }
 0x171   : > { %v4043_v29 = vpop.f32.mrf.mxu0 }
 0x172   : > { %v4003_v4 = vpop.f32.mrf.mxu1  ;;  %5194 = vst [vmem:[#allocation21_spill] sm:$0xff] %v4043_v29 }
 0x173   : > { %5187 = vst [vmem:[#allocation14_spill] sm:$0xff] %v4003_v4  ;;  %v879_v5 = vrot.slane %v4003_v4, %v3967_v48  ;;  %v4057_v38 = vpop.f32.mrf.mxu0 }
 0x174   : > { %v4007_v6 = vpop.f32.mrf.mxu1  ;;  %5197 = vst [vmem:[#allocation24_spill] sm:$0xff] %v4057_v38  ;;  %v843_v24 = vrot.slane %v4057_v38, %v3967_v48 }
 0x175   : > { %5188 = vst [vmem:[#allocation15_spill] sm:$0xff] %v4007_v6  ;;  %v935_v7 = vmul.f32 %v4003_v4, %v879_v5  ;;  %v875_v8 = vrot.slane %v4007_v6, %v3967_v48 }
 0x176   : > { %v4067_v52 = vpop.f32.mrf.mxu0 }
 0x177   : > { %v1014_v10 = vsel %vm944_vm3, %v935_v7, 0.0  ;;  %v934_v11 = vmul.f32 %v875_v8, %v4007_v6  ;;  %5198 = vst [vmem:[#allocation25_spill] sm:$0xff] %v4067_v52  ;;  %v921_v7 = vmul.f32 %v3997_v1, %v823_v55  ;;  %v831_v8 = vrot.slane %v4001_v3, %v3967_v48 }
 0x178   : > { %1015 = vadd.xlane.f32.xlu1 %v1014_v10  ;;  %v4077_v62 = vpop.f32.mrf.mxu0 }
 0x179   : > { %v1011_v14 = vsel %vm944_vm3, %v934_v11, 0.0  ;;  %5199 = vst [vmem:[#allocation26_spill] sm:$0xff] %v4077_v62  ;;  %v969_v11 = vsel %vm944_vm3, %v920_v58, 0.0  ;;  %v972_v16 = vsel %vm944_vm3, %v921_v7, 0.0 }
 0x17a   : > { %v4018_v13 = vpop.f32.mrf.mxu1 }
 0x17b   : > { %5191 = vst [vmem:[#allocation18_spill] sm:$0xff] %v4018_v13  ;;  %v887_v15 = vrot.slane %v4018_v13, %v3967_v48 }
 0x17c   : > { %1012 = vadd.xlane.f32.xlu1 %v1011_v14  ;;  %v4025_v17 = vpop.f32.mrf.mxu1  ;;  %v924_v14 = vmul.f32 %v835_v59, %v4032_v21 }
 0x17d   : > { %5192 = vst [vmem:[#allocation19_spill] sm:$0xff] %v4025_v17  ;;  %v937_v18 = vmul.f32 %v4018_v13, %v887_v15  ;;  %v883_v19 = vrot.slane %v4025_v17, %v3967_v48  ;;  %v847_v15 = vrot.slane %v4043_v29, %v3967_v48 }
 0x17e   : > { %v4083_v10 = vpop.f32.mrf.mxu0 }
 0x17f   : > { %v1020_v22 = vsel %vm944_vm3, %v937_v18, 0.0  ;;  %v936_v23 = vmul.f32 %v883_v19, %v4025_v17  ;;  %5200 = vst [vmem:[#allocation27_spill] sm:$0xff] %v4083_v10  ;;  %v923_v18 = vmul.f32 %v4001_v3, %v831_v8  ;;  %v827_v19 = vrot.slane %v4012_v9, %v3967_v48 }
 0x180   : > { %1021 = vadd.xlane.f32.xlu0 %v1020_v22  ;;  %v4093_v20 = vpop.f32.mrf.mxu0  ;;  %v981_v22 = vsel %vm944_vm3, %v924_v14, 0.0 }
 0x181   : > { %v1017_v26 = vsel %vm944_vm3, %v936_v23, 0.0  ;;  %5201 = vst [vmem:[#allocation28_spill] sm:$0xff] %v4093_v20  ;;  %v927_v23 = vmul.f32 %v4043_v29, %v847_v15  ;;  %v978_v27 = vsel %vm944_vm3, %v923_v18, 0.0  ;;  %v922_v28 = vmul.f32 %v827_v19, %v4012_v9 }
 0x182   : > { %1018 = vadd.xlane.f32.xlu1 %v1017_v26  ;;  %v4045_v30 = vpop.f32.mrf.mxu1  ;;  %v859_v14 = vrot.slane %v4093_v20, %v3967_v48 }
 0x183   : > { %5195 = vst [vmem:[#allocation22_spill] sm:$0xff] %v4045_v30  ;;  %v895_v33 = vrot.slane %v4045_v30, %v3967_v48  ;;  %v990_v32 = vsel %vm944_vm3, %v927_v23, 0.0 }
 0x184   : > { %952 = vadd.xlane.f32.xlu0 %v951_v31  ;;  %v4051_v34 = vpop.f32.mrf.mxu1  ;;  %v839_v31 = vrot.slane %v4016_v12, %v3967_v48 }
 0x185   : > { %5196 = vst [vmem:[#allocation23_spill] sm:$0xff] %v4051_v34  ;;  %v939_v40 = vmul.f32 %v4045_v30, %v895_v33  ;;  %v891_v43 = vrot.slane %v4051_v34, %v3967_v48  ;;  %v926_v33 = vmul.f32 %v843_v24, %v4057_v38 }
 0x186   : > { %958 = vadd.xlane.f32.xlu1 %v957_v35  ;;  %v4099_v25 = vpop.f32.mrf.mxu0  ;;  %v851_v35 = vrot.slane %v4077_v62, %v3967_v48 }
 0x187   : > { %v1026_v53 = vsel %vm944_vm3, %v939_v40, 0.0  ;;  %v938_v41 = vmul.f32 %v891_v43, %v4051_v34  ;;  %5202 = vst [vmem:[#allocation29_spill] sm:$0xff] %v4099_v25  ;;  %v925_v40 = vmul.f32 %v4016_v12, %v839_v31  ;;  %v855_v43 = vrot.slane %v4067_v52, %v3967_v48 }
 0x188   : > { %961 = vadd.xlane.f32.xlu0 %v960_v39  ;;  %v4111_v36 = vpop.f32.mrf.mxu0  ;;  %v975_v39 = vsel %vm944_vm3, %v922_v28, 0.0  ;;  %v987_v46 = vsel %vm944_vm3, %v926_v33, 0.0  ;;  %v928_v50 = vmul.f32 %v851_v35, %v4077_v62  ;;  %v871_v23 = vrot.slane %v4099_v25, %v3967_v48 }
 0x189   : > { %v1023_v5 = vsel %vm944_vm3, %v938_v41, 0.0  ;;  %5204 = vst [vmem:[#allocation31_spill] sm:$0xff] %v4111_v36  ;;  %v984_v41 = vsel %vm944_vm3, %v925_v40, 0.0  ;;  %v929_v55 = vmul.f32 %v4067_v52, %v855_v43 }
 0x18a   : > { %967 = vadd.xlane.f32.xlu1 %v966_v44  ;;  %v4101_v26 = vpop.f32.mrf.mxu1  ;;  %v867_v44 = vrot.slane %v4111_v36, %v3967_v48  ;;  %v993_v58 = vsel %vm944_vm3, %v928_v50, 0.0  ;;  %v933_v31 = vmul.f32 %v4099_v25, %v871_v23 }
 0x18b   : > { %5203 = vst [vmem:[#allocation30_spill] sm:$0xff] %v4101_v26  ;;  %v996_v8 = vsel %vm944_vm3, %v929_v55, 0.0 }
 0x18c   : > { %1027 = vadd.xlane.f32.xlu0 %v1026_v53  ;;  %v4113_v37 = vpop.f32.mrf.mxu1  ;;  %v932_v59 = vmul.f32 %v867_v44, %v4111_v36  ;;  %v1008_v35 = vsel %vm944_vm3, %v933_v31, 0.0 }
 0x18d   : > { %5205 = vst [vmem:[#allocation32_spill] sm:$0xff] %v4113_v37 }
 0x18e   : > { %964 = vadd.xlane.f32.xlu1 %v963_v56  ;;  %v4123_v53 = vpop.f32.mrf.mxu1  ;;  %v863_v56 = vrot.slane %v4083_v10, %v3967_v48  ;;  %v1005_v15 = vsel %vm944_vm3, %v932_v59, 0.0 }
 0x18f   : > { %5206 = vst [vmem:[#allocation33_spill] sm:$0xff] %v4123_v53  ;;  %v911_v40 = vrot.slane %v4123_v53, %v3967_v48 }
 0x190   : > { %1024 = vadd.xlane.f32.xlu0 %v1023_v5  ;;  %v899_v5 = vrot.slane %v4113_v37, %v3967_v48  ;;  %v4133_v7 = vpop.f32.mrf.mxu1 }
 0x191   : > { %5207 = vst [vmem:[#allocation34_spill] sm:$0xff] %v4133_v7  ;;  %v907_v18 = vrot.slane %v4133_v7, %v3967_v48  ;;  %v943_v44 = vmul.f32 %v4123_v53, %v911_v40 }
 0x192   : > { %970 = vadd.xlane.f32.xlu1 %v969_v11  ;;  %v931_v11 = vmul.f32 %v4083_v10, %v863_v56 }
 0x194   : > { %973 = vadd.xlane.f32.xlu0 %v972_v16  ;;  %v940_v16 = vmul.f32 %v899_v5, %v4113_v37  ;;  %v1002_v19 = vsel %vm944_vm3, %v931_v11, 0.0 }
 0x196   : > { %982 = vadd.xlane.f32.xlu1 %v981_v22  ;;  %v930_v22 = vmul.f32 %v859_v14, %v4093_v20  ;;  %v1029_v24 = vsel %vm944_vm3, %v940_v16, 0.0 }
 0x198   : > { %979 = vadd.xlane.f32.xlu0 %v978_v27  ;;  %v942_v27 = vmul.f32 %v907_v18, %v4133_v7  ;;  %v999_v28 = vsel %vm944_vm3, %v930_v22, 0.0 }
 0x19a   : > { %991 = vadd.xlane.f32.xlu1 %v990_v32  ;;  %v903_v32 = vrot.slane %v4101_v26, %v3967_v48  ;;  %v1035_v33 = vsel %vm944_vm3, %v942_v27, 0.0 }
 0x19c   : > { %976 = vadd.xlane.f32.xlu0 %v975_v39  ;;  %v941_v39 = vmul.f32 %v4101_v26, %v903_v32 }
 0x19e   : > { %988 = vadd.xlane.f32.xlu1 %v987_v46  ;;  %v1032_v43 = vsel %vm944_vm3, %v941_v39, 0.0  ;;  %v1038_v46 = vsel %vm944_vm3, %v943_v44, 0.0  ;;  %v4178_v39 = vsub.s32 %v3864_v42, %v3964_v47  ;;  %vm1401_vm3 = vcmask 1045509  }
 0x1a0   : > { %985 = vadd.xlane.f32.xlu0 %v984_v41 }
 0x1a2   : > { %994 = vadd.xlane.f32.xlu1 %v993_v58 }
 0x1a4   : > { %997 = vadd.xlane.f32.xlu0 %v996_v8 }
 0x1a6   : > { %1006 = vadd.xlane.f32.xlu1 %v1005_v15 }
 0x1a8   : > { %1003 = vadd.xlane.f32.xlu0 %v1002_v19 }
 0x1aa   : > { %1030 = vadd.xlane.f32.xlu1 %v1029_v24 }
 0x1ac   : > { %1000 = vadd.xlane.f32.xlu0 %v999_v28 }
 0x1ae   : > { %1036 = vadd.xlane.f32.xlu1 %v1035_v33 }
 0x1b0   : > { %1009 = vadd.xlane.f32.xlu0 %v1008_v35 }
 0x1b4   : > { %1033 = vadd.xlane.f32.xlu0 %v1032_v43 }
 0x1b8   : > { %1039 = vadd.xlane.f32.xlu0 %v1038_v46 }
 0x1e4   : > { %v950_v50 = vpop.xlane.xlu1 %949 }
 0x1e5   : > { %vm1042_vm5 = vcmp.ne.f32.partialorder %v950_v50, 0.0 }
 0x1e6   : > { %v947_v41 = vpop.xlane.xlu0 %946  ;;  %v3374_v59 = vsel %vm1042_vm5, 1.0, %v5141_v45  ;;  %vm1403_vm5 = vcmask 1046534  }
 0x1e7   : > { %vm1041_vm4 = vcmp.ne.f32.partialorder %v947_v41, 0.0  ;;  %v3406_v14 = vadd.f32 -1.0, %v3374_v59 }
 0x1e8   : > { %v3373_v58 = vsel %vm1041_vm4, 1.0, %v5141_v45 }
 0x1e9   : > { %v3405_v8 = vadd.f32 -1.0, %v3373_v58  ;;  %v1170_v23 = vmul.f32 9999.0, %v3406_v14 }
 0x1ea   : > { %v956_v56 = vpop.xlane.xlu0 %955 }
 0x1eb   : > { %vm1044_vm6 = vcmp.ne.f32.partialorder %v956_v56, 0.0  ;;  %v1169_v18 = vmul.f32 9999.0, %v3405_v8  ;;  %v4180_v40 = vadd.f32 %v1170_v23, %v950_v50 }
 0x1ec   : > { %v3376_v15 = vsel %vm1044_vm6, 1.0, %v5141_v45 }
 0x1ed   : > { %v3408_v19 = vadd.f32 -1.0, %v3376_v15  ;;  %v4173_v28 = vadd.f32 %v1169_v18, %v947_v41  ;;  %v1272_v50 = vrot.slane %v4180_v40, %v4178_v39 }
 0x1ef   : > { %v1172_v32 = vmul.f32 9999.0, %v3408_v19  ;;  %v1268_v41 = vrot.slane %v4173_v28, %v4178_v39 }
 0x1f1   : > { %v4187_v14 = vadd.f32 %v1172_v32, %v956_v56  ;;  %v1394_v56 = vsel %vm1393_vm11, %v1272_v50, %v1268_v41 }
 0x1f3   : > { %v1280_v32 = vrot.slane %v4187_v14, %v4178_v39 }
 0x201   : > { %v4161_v55 = vpop.xlane.xlu1 %1015 }
 0x202   : > { %vm1064_vm14 = vcmp.ne.f32.partialorder %v4161_v55, 0.0 }
 0x205   : > { %v4165_v5 = vpop.xlane.xlu1 %1012 }
 0x206   : > { %vm1063_vm15 = vcmp.ne.f32.partialorder %v4165_v5, 0.0 }
 0x209   : > { %v4167_v11 = vpop.xlane.xlu0 %1021 }
 0x20a   : > { %vm1066_vm6 = vcmp.ne.f32.partialorder %v4167_v11, 0.0 }
 0x20b   : > { %v4170_v16 = vpop.xlane.xlu1 %1018 }
 0x20d   : > { %v953_v22 = vpop.xlane.xlu0 %952 }
 0x20e   : > { %vm1043_vm7 = vcmp.ne.f32.partialorder %v953_v22, 0.0 }
 0x20f   : > { %v3375_v24 = vsel %vm1043_vm7, 1.0, %v5141_v45  ;;  %v959_v27 = vpop.xlane.xlu1 %958 }
 0x210   : > { %v3407_v31 = vadd.f32 -1.0, %v3375_v24  ;;  %vm1045_vm8 = vcmp.ne.f32.partialorder %v959_v27, 0.0 }
 0x211   : > { %v3377_v33 = vsel %vm1045_vm8, 1.0, %v5141_v45  ;;  %v962_v35 = vpop.xlane.xlu0 %961  ;;  %vm1405_vm8 = vcmask 1047559  }
 0x212   : > { %v1171_v43 = vmul.f32 9999.0, %v3407_v31  ;;  %v3409_v44 = vadd.f32 -1.0, %v3377_v33  ;;  %vm1046_vm9 = vcmp.ne.f32.partialorder %v962_v35, 0.0 }
 0x213   : > { %v968_v46 = vpop.xlane.xlu1 %967  ;;  %v3378_v8 = vsel %vm1046_vm9, 1.0, %v5141_v45  ;;  %vm1065_vm9 = vcmp.ne.f32.partialorder %v4170_v16, 0.0 }
 0x214   : > { %v4184_v58 = vadd.f32 %v1171_v43, %v953_v22  ;;  %v1173_v59 = vmul.f32 9999.0, %v3409_v44  ;;  %v3410_v15 = vadd.f32 -1.0, %v3378_v8  ;;  %vm1048_vm10 = vcmp.ne.f32.partialorder %v968_v46, 0.0 }
 0x215   : > { %v4189_v18 = vpop.xlane.xlu0 %1027  ;;  %v3380_v23 = vsel %vm1048_vm10, 1.0, %v5141_v45 }
 0x216   : > { %v1276_v19 = vrot.slane %v4184_v58, %v4178_v39  ;;  %v4196_v22 = vadd.f32 %v1173_v59, %v959_v27  ;;  %v1174_v24 = vmul.f32 9999.0, %v3410_v15  ;;  %v3412_v31 = vadd.f32 -1.0, %v3380_v23 }
 0x217   : > { %v965_v33 = vpop.xlane.xlu1 %964 }
 0x218   : > { %vm1047_vm13 = vcmp.ne.f32.partialorder %v965_v33, 0.0  ;;  %v1396_v43 = vsel %vm1395_vm12, %v1276_v19, %v1394_v56  ;;  %v4207_v27 = vadd.f32 %v1174_v24, %v962_v35  ;;  %v1176_v59 = vmul.f32 9999.0, %v3412_v31 }
 0x219   : > { %v3379_v44 = vsel %vm1047_vm13, 1.0, %v5141_v45  ;;  %v4204_v8 = vpop.xlane.xlu0 %1024  ;;  %v1284_v41 = vrot.slane %v4196_v22, %v4178_v39  ;;  %v1398_v19 = vsel %vm1397_vm1, %v1280_v32, %v1396_v43  ;;  %v3396_v56 = vsel %vm1064_vm14, 1.0, %v5141_v45 }
 0x21a   : > { %v3411_v15 = vadd.f32 -1.0, %v3379_v44  ;;  %v3395_v35 = vsel %vm1063_vm15, 1.0, %v5141_v45  ;;  %v1288_v44 = vrot.slane %v4207_v27, %v4178_v39  ;;  %v4220_v53 = vadd.f32 %v1176_v59, %v968_v46 }
 0x21b   : > { %v971_v50 = vpop.xlane.xlu1 %970  ;;  %v1400_v25 = vsel %vm1399_vm2, %v1284_v41, %v1398_v19  ;;  %v3428_v7 = vadd.f32 -1.0, %v3396_v56  ;;  %v3427_v10 = vadd.f32 -1.0, %v3395_v35  ;;  %v3398_v46 = vsel %vm1066_vm6, 1.0, %v5141_v45 }
 0x21c   : > { %v1175_v23 = vmul.f32 9999.0, %v3411_v15  ;;  %vm1049_vm4 = vcmp.ne.f32.partialorder %v971_v50, 0.0  ;;  %vm1432_vm13 = vcmask 64520   ;;  %v1296_v59 = vrot.slane %v4220_v53, %v4178_v39 }
 0x21d   : > { %v3381_v24 = vsel %vm1049_vm4, 1.0, %v5141_v45  ;;  %v974_v31 = vpop.xlane.xlu0 %973  ;;  %v1402_v19 = vsel %vm1401_vm3, %v1288_v44, %v1400_v25  ;;  %v4237_v6 = vmul.f32 9999.0, %v3428_v7  ;;  %v4239_v52 = vmul.f32 9999.0, %v3427_v10 }
 0x21e   : > { %v4222_v15 = vadd.f32 %v1175_v23, %v965_v33  ;;  %vm1050_vm7 = vcmp.ne.f32.partialorder %v974_v31, 0.0  ;;  %v3413_v32 = vadd.f32 -1.0, %v3381_v24  ;;  %v3430_v36 = vadd.f32 -1.0, %v3398_v46 }
 0x21f   : > { %v3382_v43 = vsel %vm1050_vm7, 1.0, %v5141_v45  ;;  %v983_v26 = vpop.xlane.xlu1 %982  ;;  %vm1068_vm7 = vcmp.ne.f32.partialorder %v4189_v18, 0.0 }
 0x220   : > { %v1292_v4 = vrot.slane %v4222_v15, %v4178_v39  ;;  %v3414_v20 = vadd.f32 -1.0, %v3382_v43  ;;  %vm1053_vm10 = vcmp.ne.f32.partialorder %v983_v26, 0.0  ;;  %v1177_v56 = vmul.f32 9999.0, %v3413_v32 }
 0x221   : > { %v980_v33 = vpop.xlane.xlu0 %979  ;;  %v3385_v23 = vsel %vm1053_vm10, 1.0, %v5141_v45 }
 0x222   : > { %v1178_v41 = vmul.f32 9999.0, %v3414_v20  ;;  %v3417_v35 = vadd.f32 -1.0, %v3385_v23  ;;  %vm1052_vm14 = vcmp.ne.f32.partialorder %v980_v33, 0.0  ;;  %v1404_v43 = vsel %vm1403_vm5, %v1292_v4, %v1402_v19 }
 0x223   : > { %v992_v24 = vpop.xlane.xlu1 %991  ;;  %v3384_v12 = vsel %vm1052_vm14, 1.0, %v5141_v45  ;;  %v3397_v20 = vsel %vm1065_vm9, 1.0, %v5141_v45  ;;  %v1406_v25 = vsel %vm1405_vm8, %v1296_v59, %v1404_v43  ;;  %v4250_v10 = vadd.f32 %v1177_v56, %v971_v50 }
 0x224   : > { %v3416_v62 = vadd.f32 -1.0, %v3384_v12  ;;  %vm1056_vm15 = vcmp.ne.f32.partialorder %v992_v24, 0.0  ;;  %v4246_v32 = vadd.f32 %v1178_v41, %v974_v31  ;;  %v1433_v7 = vsel %vm1432_vm13, %v1406_v25, -inf }
 0x225   : > { %v977_v44 = vpop.xlane.xlu0 %976  ;;  %v3388_v4 = vsel %vm1056_vm15, 1.0, %v5141_v45  ;;  %v1181_v46 = vmul.f32 9999.0, %v3417_v35  ;;  %1434 = vmax.xlane.f32.xlu1 %v1433_v7  ;;  %v4253_v12 = vmul.f32 9999.0, %v3430_v36  ;;  %v3429_v29 = vadd.f32 -1.0, %v3397_v20 }
 0x226   : > { %vm1051_vm4 = vcmp.ne.f32.partialorder %v977_v44, 0.0  ;;  %v1180_v23 = vmul.f32 9999.0, %v3416_v62  ;;  %vm1067_vm9 = vcmp.ne.f32.partialorder %v4204_v8, 0.0  ;;  %v3420_v31 = vadd.f32 -1.0, %v3388_v4 }
 0x227   : > { %v3383_v19 = vsel %vm1051_vm4, 1.0, %v5141_v45  ;;  %v989_v3 = vpop.xlane.xlu1 %988  ;;  %v1304_v62 = vrot.slane %v4246_v32, %v4178_v39  ;;  %v1300_v36 = vrot.slane %v4250_v10, %v4178_v39  ;;  %v4262_v43 = vadd.f32 %v1181_v46, %v983_v26 }
 0x228   : > { %v3415_v59 = vadd.f32 -1.0, %v3383_v19  ;;  %vm1055_vm6 = vcmp.ne.f32.partialorder %v989_v3, 0.0  ;;  %v4264_v20 = vadd.f32 %v1180_v23, %v980_v33  ;;  %v1193_v38 = vmul.f32 9999.0, %v3429_v29 }
 0x229   : > { %v3387_v41 = vsel %vm1055_vm6, 1.0, %v5141_v45  ;;  %v986_v50 = vpop.xlane.xlu0 %985  ;;  %v3399_v33 = vsel %vm1067_vm9, 1.0, %v5141_v45  ;;  %v1407_v46 = vsel %vm1393_vm11, %v1304_v62, %v1300_v36  ;;  %v1316_v21 = vrot.slane %v4262_v43, %v4178_v39 }
 0x22a   : > { %v1179_v56 = vmul.f32 9999.0, %v3415_v59  ;;  %v3419_v35 = vadd.f32 -1.0, %v3387_v41  ;;  %vm1054_vm10 = vcmp.ne.f32.partialorder %v986_v50, 0.0  ;;  %v3400_v59 = vsel %vm1068_vm7, 1.0, %v5141_v45 }
 0x22b   : > { %v3386_v25 = vsel %vm1054_vm10, 1.0, %v5141_v45  ;;  %v995_v7 = vpop.xlane.xlu1 %994  ;;  %v1184_v41 = vmul.f32 9999.0, %v3420_v31  ;;  %v1312_v29 = vrot.slane %v4264_v20, %v4178_v39  ;;  %v5208_v36 = vmov 0.0  }
 0x22c   : > { %v4267_v4 = vadd.f32 %v1179_v56, %v977_v44  ;;  %v1183_v19 = vmul.f32 9999.0, %v3419_v35  ;;  %v3418_v9 = vadd.f32 -1.0, %v3386_v25  ;;  %vm1057_vm14 = vcmp.ne.f32.partialorder %v995_v7, 0.0 }
 0x22d   : > { %v3389_v1 = vsel %vm1057_vm14, 1.0, %v5141_v45  ;;  %v998_v26 = vpop.xlane.xlu0 %997  ;;  %v3432_v25 = vadd.f32 -1.0, %v3400_v59  ;;  %v4288_v62 = vadd.f32 %v1184_v41, %v992_v24 }
 0x22e   : > { %v1308_v44 = vrot.slane %v4267_v4, %v4178_v39  ;;  %v1182_v23 = vmul.f32 9999.0, %v3418_v9  ;;  %v4281_v56 = vadd.f32 %v1183_v19, %v989_v3  ;;  %v3421_v35 = vadd.f32 -1.0, %v3389_v1 }
 0x22f   : > { %vm1058_vm15 = vcmp.ne.f32.partialorder %v998_v26, 0.0  ;;  %v1007_v31 = vpop.xlane.xlu1 %1006  ;;  %v3431_v19 = vadd.f32 -1.0, %v3399_v33 }
 0x230   : > { %v1408_v45 = vsel %vm1395_vm12, %v1308_v44, %v1407_v46  ;;  %v4286_v30 = vadd.f32 %v1182_v23, %v986_v50  ;;  %v3390_v9 = vsel %vm1058_vm15, 1.0, %v5208_v36  ;;  %vm1061_vm4 = vcmp.ne.f32.partialorder %v1007_v31, 0.0 }
 0x231   : > { %v1004_v2 = vpop.xlane.xlu0 %1003  ;;  %v1409_v3 = vsel %vm1397_vm1, %v1312_v29, %v1408_v45  ;;  %v3422_v59 = vadd.f32 -1.0, %v3390_v9  ;;  %v3393_v34 = vsel %vm1061_vm4, 1.0, %v5208_v36  ;;  %v1324_v46 = vrot.slane %v4281_v56, %v4178_v39 }
 0x232   : > { %v1320_v1 = vrot.slane %v4286_v30, %v4178_v39  ;;  %v1185_v50 = vmul.f32 9999.0, %v3421_v35  ;;  %vm1060_vm6 = vcmp.ne.f32.partialorder %v1004_v2, 0.0  ;;  %v1410_v41 = vsel %vm1399_vm2, %v1316_v21, %v1409_v3 }
 0x233   : > { %v1031_v24 = vpop.xlane.xlu1 %1030  ;;  %v1186_v44 = vmul.f32 9999.0, %v3422_v59  ;;  %v3425_v23 = vadd.f32 -1.0, %v3393_v34  ;;  %v3392_v37 = vsel %vm1060_vm6, 1.0, %v5208_v36  ;;  %v1328_v45 = vrot.slane %v4288_v62, %v4178_v39 }
 0x234   : > { %vm1069_vm7 = vcmp.ne.f32.partialorder %v1031_v24, 0.0  ;;  %v3424_v33 = vadd.f32 -1.0, %v3392_v37  ;;  %v1411_v13 = vsel %vm1401_vm3, %v1320_v1, %v1410_v41  ;;  %v1195_v17 = vmul.f32 9999.0, %v3431_v19 }
 0x235   : > { %v3401_v29 = vsel %vm1069_vm7, 1.0, %v5208_v36  ;;  %v1001_v9 = vpop.xlane.xlu0 %1000  ;;  %v4303_v35 = vadd.f32 %v1186_v44, %v998_v26  ;;  %v1412_v21 = vsel %vm1403_vm5, %v1324_v46, %v1411_v13  ;;  %v4308_v60 = vadd.f32 %v1185_v50, %v995_v7 }
 0x236   : > { %vm1059_vm9 = vcmp.ne.f32.partialorder %v1001_v9, 0.0  ;;  %v1188_v3 = vmul.f32 9999.0, %v3424_v33  ;;  %v3433_v34 = vadd.f32 -1.0, %v3401_v29  ;;  %v1413_v0 = vsel %vm1405_vm8, %v1328_v45, %v1412_v21 }
 0x237   : > { %v3391_v59 = vsel %vm1059_vm9, 1.0, %v5208_v36  ;;  %v1037_v63 = vpop.xlane.xlu1 %1036  ;;  %v1189_v37 = vmul.f32 9999.0, %v3425_v23  ;;  %v4312_v19 = vadd.f32 %v4239_v52, %v4165_v5  ;;  %v4316_v26 = vadd.f32 %v4253_v12, %v4167_v11 }
 0x238   : > { %v3423_v61 = vadd.f32 -1.0, %v3391_v59  ;;  %vm1071_vm10 = vcmp.ne.f32.partialorder %v1037_v63, 0.0  ;;  %v4319_v13 = vadd.f32 %v1193_v38, %v4170_v16  ;;  %v1436_v1 = vsel %vm1432_vm13, %v1413_v0, -inf }
 0x239   : > { %v1010_v46 = vpop.xlane.xlu0 %1009  ;;  %v4323_v7 = vadd.f32 %v1195_v17, %v4204_v8  ;;  %v1336_v50 = vrot.slane %v4303_v35, %v4178_v39  ;;  %v3403_v52 = vsel %vm1071_vm10, 1.0, %v5208_v36  ;;  %1437 = vmax.xlane.f32.xlu0 %v1436_v1  ;;  %v1196_v5 = vmul.f32 9999.0, %v3432_v25 }
 0x23a   : > { %v1187_v41 = vmul.f32 9999.0, %v3423_v61  ;;  %v4328_v44 = vadd.f32 %v1188_v3, %v1004_v2  ;;  %v1197_v11 = vmul.f32 9999.0, %v3433_v34  ;;  %vm1062_vm14 = vcmp.ne.f32.partialorder %v1010_v46, 0.0 }
 0x23b   : > { %v1332_v38 = vrot.slane %v4308_v60, %v4178_v39  ;;  %v4332_v0 = vadd.f32 %v1189_v37, %v1007_v31  ;;  %v3394_v17 = vsel %vm1062_vm14, 1.0, %v5208_v36  ;;  %v1368_v61 = vrot.slane %v4316_v26, %v4178_v39 }
 0x23c   : > { %v4334_v16 = vadd.f32 %v1187_v41, %v1001_v9  ;;  %v1364_v8 = vrot.slane %v4319_v13, %v4178_v39  ;;  %v3435_v12 = vadd.f32 -1.0, %v3403_v52  ;;  %v3426_v2 = vadd.f32 -1.0, %v3394_v17 }
 0x23d   : > { %v1034_v25 = vpop.xlane.xlu0 %1033  ;;  %v1372_v23 = vrot.slane %v4323_v7, %v4178_v39  ;;  %v1414_v45 = vsel %vm1393_vm11, %v1336_v50, %v1332_v38  ;;  %v1344_v33 = vrot.slane %v4328_v44, %v4178_v39  ;;  %v4348_v29 = vadd.f32 %v1197_v11, %v1031_v24 }
 0x23e   : > { %v1340_v31 = vrot.slane %v4334_v16, %v4178_v39  ;;  %vm1070_vm15 = vcmp.ne.f32.partialorder %v1034_v25, 0.0  ;;  %v1190_v9 = vmul.f32 9999.0, %v3426_v2  ;;  %v4352_v3 = vadd.f32 %v1196_v5, %v4189_v18 }
 0x23f   : > { %v3402_v21 = vsel %vm1070_vm15, 1.0, %v5208_v36  ;;  %v1348_v34 = vrot.slane %v4332_v0, %v4178_v39  ;;  %v4359_v1 = vadd.f32 %v4237_v6, %v4161_v55  ;;  %v1199_v50 = vmul.f32 9999.0, %v3435_v12 }
 0x240   : > { %v1415_v59 = vsel %vm1395_vm12, %v1340_v31, %v1414_v45  ;;  %v3434_v37 = vadd.f32 -1.0, %v3402_v21  ;;  %v4361_v41 = vadd.f32 %v1190_v9, %v1010_v46  ;;  %v1421_v11 = vsel %vm1393_vm11, %v1368_v61, %v1364_v8 }
 0x241   : > { %v1040_v24 = vpop.xlane.xlu0 %1039  ;;  %v1416_v52 = vsel %vm1397_vm1, %v1344_v33, %v1415_v59  ;;  %v1422_v38 = vsel %vm1395_vm12, %v1372_v23, %v1421_v11  ;;  %v1380_v17 = vrot.slane %v4348_v29, %v4178_v39  ;;  %v1356_v46 = vrot.slane %v4312_v19, %v4178_v39 }
 0x242   : > { %v1198_v18 = vmul.f32 9999.0, %v3434_v37  ;;  %vm1072_vm4 = vcmp.ne.f32.partialorder %v1040_v24, 0.0  ;;  %v1417_v5 = vsel %vm1399_vm2, %v1348_v34, %v1416_v52  ;;  %v1352_v6 = vrot.slane %v4361_v41, %v4178_v39 }
 0x243   : > { %v3404_v55 = vsel %vm1072_vm4, 1.0, %v5208_v36  ;;  %v1376_v61 = vrot.slane %v4352_v3, %v4178_v39  ;;  %v1360_v2 = vrot.slane %v4359_v1, %v4178_v39  ;;  %v4380_v23 = vadd.f32 %v1199_v50, %v1037_v63 }
 0x244   : > { %v4376_v8 = vadd.f32 %v1198_v18, %v1034_v25  ;;  %v3436_v12 = vadd.f32 -1.0, %v3404_v55  ;;  %v1418_v45 = vsel %vm1401_vm3, %v1352_v6, %v1417_v5  ;;  %v4410_v6 = vsub.s32 3, %v3964_v47 }
 0x245   : > { %v1419_v9 = vsel %vm1403_vm5, %v1356_v46, %v1418_v45  ;;  %v1423_v21 = vsel %vm1397_vm1, %v1376_v61, %v1422_v38  ;;  %v1388_v50 = vrot.slane %v4380_v23, %v4178_v39  ;;  %v4404_v38 = vsub.s32 2, %v3964_v47 }
 0x246   : > { %v1384_v31 = vrot.slane %v4376_v8, %v4178_v39  ;;  %v1200_v33 = vmul.f32 9999.0, %v3436_v12  ;;  %v1420_v34 = vsel %vm1405_vm8, %v1360_v2, %v1419_v9  ;;  %v1424_v25 = vsel %vm1399_vm2, %v1380_v17, %v1423_v21 }
 0x247   : > { %v1439_v37 = vsel %vm1432_vm13, %v1420_v34, -inf  ;;  %5210 = vst [vmem:[#allocation36_spill] sm:$0xff] %v4404_v38  ;;  %v4407_v17 = vsub.s32 4, %v3964_v47  ;;  %v4419_v2 = vsub.s32 5, %v3964_v47  ;;  %v4427_v34 = vsub.s32 7, %v3964_v47 }
 0x248   : > { %v4389_v59 = vadd.f32 %v1200_v33, %v1040_v24  ;;  %v1425_v63 = vsel %vm1401_vm3, %v1384_v31, %v1424_v25  ;;  %1440 = vmax.xlane.f32.xlu1 %v1439_v37  ;;  %v4401_v24 = vsub.s32 1, %v3964_v47  ;;  %vm2566_vm6 = vcmask 260096  }
 0x249   : > { %v1426_v11 = vsel %vm1403_vm5, %v1388_v50, %v1425_v63  ;;  %vm2955_vm7 = vcmask 261120  }
 0x24a   : > { %v1392_v52 = vrot.slane %v4389_v59, %v4178_v39  ;;  %5209 = vst [vmem:[#allocation35_spill] sm:$0xff] %v4401_v24  ;;  %v4413_v39 = vsub.s32 6, %v3964_v47 }
 0x24c   : > { %v1427_v18 = vsel %vm1405_vm8, %v1392_v52, %v1426_v11 }
 0x24d   : > { %v1442_v5 = vsel %vm1432_vm13, %v1427_v18, -inf  ;;  %vm1994_vm13 = vcmask 56320  }
 0x24e   : > { %1443 = vmax.xlane.f32.xlu0 %v1442_v5 }
 0x2ae   : > { %v1435_v55 = vpop.xlane.xlu1 %1434 }
 0x2af   : > { %v1452_v46 = vrot.slane %v1435_v55, %v3967_v48  ;;  %v1456_v61 = vrot.slane %v1435_v55, %v4401_v24  ;;  %v1460_v12 = vrot.slane %v1435_v55, %v4404_v38  ;;  %v1468_v45 = vrot.slane %v1435_v55, %v4407_v17 }
 0x2b0   : > { %v1464_v31 = vrot.slane %v1435_v55, %v4410_v6  ;;  %v1476_v25 = vrot.slane %v1435_v55, %v4413_v39  ;;  %v1472_v52 = vrot.slane %v1435_v55, %v4419_v2 }
 0x2b1   : > { %v1609_v33 = vsub.f32 %v4173_v28, %v1452_v46  ;;  %v1610_v9 = vsub.f32 %v4180_v40, %v1456_v61  ;;  %v1611_v21 = vsub.f32 %v4184_v58, %v1460_v12  ;;  %v1613_v37 = vsub.f32 %v4196_v22, %v1468_v45 }
 0x2b2   : > { %v1612_v11 = vsub.f32 %v4187_v14, %v1464_v31  ;;  %v1480_v28 = vrot.slane %v1435_v55, %v4427_v34  ;;  %v1615_v40 = vsub.f32 %v4222_v15, %v1476_v25  ;;  %v1614_v5 = vsub.f32 %v4207_v27, %v1472_v52 }
 0x2b3   : > { %v1641_v63 = vmul.f32 1.442695, %v1609_v33  ;;  %v1643_v50 = vmul.f32 1.442695, %v1610_v9  ;;  %v1645_v18 = vmul.f32 1.442695, %v1611_v21 }
 0x2b4   : > { %v1649_v58 = vmul.f32 1.442695, %v1613_v37  ;;  %v1647_v46 = vmul.f32 1.442695, %v1612_v11  ;;  %v1616_v22 = vsub.f32 %v4220_v53, %v1480_v28  ;;  %v1653_v61 = vmul.f32 1.442695, %v1615_v40 }
 0x2b5   : > { %3615 = vpow2.f32 %v1641_v63  ;;  %v1651_v12 = vmul.f32 1.442695, %v1614_v5 }
 0x2b6   : > { %3617 = vpow2.f32 %v1643_v50  ;;  %v1655_v14 = vmul.f32 1.442695, %v1616_v22 }
 0x2b7   : > { %3619 = vpow2.f32 %v1645_v18 }
 0x2b8   : > { %3621 = vpow2.f32 %v1649_v58 }
 0x2b9   : > { %3623 = vpow2.f32 %v1647_v46 }
 0x2ba   : > { %3625 = vpow2.f32 %v1653_v61 }
 0x2bb   : > { %3627 = vpow2.f32 %v1651_v12 }
 0x2bc   : > { %3629 = vpow2.f32 %v1655_v14 }
 0x2c2   : > { %v4437_v45 = vpop.eup %3615  ;;  %v1438_v21 = vpop.xlane.xlu0 %1437 }
 0x2c3   : > { %v4439_v55 = vpop.eup %3617  ;;  %1738 = vperm.xlu1 %3614, %v4437_v45   ;;  %v1484_v28 = vrot.slane %v1438_v21, %v3967_v48  ;;  %v1500_v61 = vrot.slane %v1438_v21, %v4407_v17 }
 0x2c4   : > { %1741 = vperm.xlu0 %3613, %v4439_v55   ;;  %v4443_v27 = vpop.eup %3619 }
 0x2c5   : > { %v4445_v15 = vpop.eup %3621  ;;  %v1617_v12 = vsub.f32 %v4250_v10, %v1484_v28  ;;  %v1496_v28 = vrot.slane %v1438_v21, %v4410_v6 }
 0x2c6   : > { %v4449_v53 = vpop.eup %3623 }
 0x2c7   : > { %1744 = vperm.xlu1 %3614, %v4443_v27   ;;  %v4451_v31 = vpop.eup %3625 }
 0x2c8   : > { %1750 = vperm.xlu0 %3613, %v4445_v15   ;;  %v4455_v33 = vpop.eup %3627 }
 0x2c9   : > { %v4457_v9 = vpop.eup %3629 }
 0x2cb   : > { %1747 = vperm.xlu1 %3614, %v4449_v53  }
 0x2cc   : > { %1756 = vperm.xlu0 %3613, %v4451_v31  }
 0x2cf   : > { %1753 = vperm.xlu1 %3614, %v4455_v33  }
 0x2d0   : > { %1759 = vperm.xlu0 %3613, %v4457_v9  }
 0x2d7   : > { %v4461_v25 = vpop.xlane.xlu0 %1443 }
 0x2d8   : > { %v1548_v37 = vrot.slane %v4461_v25, %v3967_v48  ;;  %v1552_v63 = vrot.slane %v4461_v25, %v4401_v24  ;;  %v1556_v50 = vrot.slane %v4461_v25, %v4404_v38  ;;  %v1564_v52 = vrot.slane %v4461_v25, %v4407_v17 }
 0x2d9   : > { %v1560_v58 = vrot.slane %v4461_v25, %v4410_v6 }
 0x2da   : > { %v1633_v11 = vsub.f32 %v4319_v13, %v1548_v37  ;;  %v1634_v18 = vsub.f32 %v4316_v26, %v1552_v63  ;;  %v1637_v40 = vsub.f32 %v4348_v29, %v1564_v52  ;;  %v1635_v5 = vsub.f32 %v4323_v7, %v1556_v50 }
 0x2db   : > { %v1488_v13 = vrot.slane %v1438_v21, %v4401_v24  ;;  %v1636_v26 = vsub.f32 %v4352_v3, %v1560_v58  ;;  %v1508_v29 = vrot.slane %v1438_v21, %v4413_v39  ;;  %v1621_v63 = vsub.f32 %v4262_v43, %v1500_v61  ;;  %v4490_v43 = vpop.xlane.xlu1 %1440 }
 0x2dc   : > { %v1689_v46 = vmul.f32 1.442695, %v1633_v11  ;;  %v1691_v22 = vmul.f32 1.442695, %v1634_v18  ;;  %v1697_v14 = vmul.f32 1.442695, %v1637_v40  ;;  %v1492_v7 = vrot.slane %v1438_v21, %v4404_v38 }
 0x2dd   : > { %v1693_v37 = vmul.f32 1.442695, %v1635_v5  ;;  %v1657_v52 = vmul.f32 1.442695, %v1617_v12  ;;  %v1618_v50 = vsub.f32 %v4246_v32, %v1488_v13  ;;  %v1695_v10 = vmul.f32 1.442695, %v1636_v26 }
 0x2de   : > { %3631 = vpow2.f32 %v1689_v46  ;;  %v1512_v11 = vrot.slane %v1438_v21, %v4427_v34  ;;  %v1623_v18 = vsub.f32 %v4281_v56, %v1508_v29  ;;  %v1665_v3 = vmul.f32 1.442695, %v1621_v63 }
 0x2df   : > { %3633 = vpow2.f32 %v1691_v22  ;;  %v1619_v40 = vsub.f32 %v4267_v4, %v1492_v7  ;;  %v1659_v58 = vmul.f32 1.442695, %v1618_v50  ;;  %v1516_v46 = vrot.slane %v4490_v43, %v3967_v48 }
 0x2e0   : > { %3635 = vpow2.f32 %v1697_v14  ;;  %v1624_v5 = vsub.f32 %v4288_v62, %v1512_v11  ;;  %v1669_v32 = vmul.f32 1.442695, %v1623_v18  ;;  %v1504_v56 = vrot.slane %v1438_v21, %v4419_v2 }
 0x2e1   : > { %3637 = vpow2.f32 %v1693_v37  ;;  %v1620_v61 = vsub.f32 %v4264_v20, %v1496_v28  ;;  %v1661_v12 = vmul.f32 1.442695, %v1619_v40  ;;  %v1532_v14 = vrot.slane %v4490_v43, %v4407_v17 }
 0x2e2   : > { %3639 = vpow2.f32 %v1657_v52  ;;  %v1671_v62 = vmul.f32 1.442695, %v1624_v5  ;;  %v1625_v13 = vsub.f32 %v4308_v60, %v1516_v46  ;;  %v1622_v21 = vsub.f32 %v4286_v30, %v1504_v56 }
 0x2e3   : > { %3641 = vpow2.f32 %v1695_v10  ;;  %v1663_v20 = vmul.f32 1.442695, %v1620_v61  ;;  %v1520_v37 = vrot.slane %v4490_v43, %v4401_v24  ;;  %v1540_v63 = vrot.slane %v4490_v43, %v4413_v39 }
 0x2e4   : > { %3643 = vpow2.f32 %v1665_v3  ;;  %v1629_v60 = vsub.f32 %v4332_v0, %v1532_v14  ;;  %v1673_v52 = vmul.f32 1.442695, %v1625_v13  ;;  %v1667_v30 = vmul.f32 1.442695, %v1622_v21 }
 0x2e5   : > { %3645 = vpow2.f32 %v1659_v58  ;;  %v1524_v50 = vrot.slane %v4490_v43, %v4404_v38  ;;  %v1626_v10 = vsub.f32 %v4303_v35, %v1520_v37  ;;  %v1544_v18 = vrot.slane %v4490_v43, %v4427_v34 }
 0x2e6   : > { %3647 = vpow2.f32 %v1669_v32  ;;  %v1631_v0 = vsub.f32 %v4312_v19, %v1540_v63  ;;  %v1681_v3 = vmul.f32 1.442695, %v1629_v60  ;;  %v1528_v40 = vrot.slane %v4490_v43, %v4410_v6 }
 0x2e7   : > { %3649 = vpow2.f32 %v1661_v12  ;;  %v1627_v35 = vsub.f32 %v4334_v16, %v1524_v50  ;;  %v1675_v58 = vmul.f32 1.442695, %v1626_v10  ;;  %v1632_v32 = vsub.f32 %v4359_v1, %v1544_v18 }
 0x2e8   : > { %3651 = vpow2.f32 %v1671_v62  ;;  %v1685_v19 = vmul.f32 1.442695, %v1631_v0  ;;  %v1572_v46 = vrot.slane %v4461_v25, %v4413_v39  ;;  %v1536_v61 = vrot.slane %v4490_v43, %v4419_v2 }
 0x2e9   : > { %3653 = vpow2.f32 %v1663_v20  ;;  %v1628_v16 = vsub.f32 %v4328_v44, %v1528_v40  ;;  %v1677_v12 = vmul.f32 1.442695, %v1627_v35  ;;  %v1687_v1 = vmul.f32 1.442695, %v1632_v32 }
 0x2ea   : > { %3655 = vpow2.f32 %v1673_v52  ;;  %v1639_v14 = vsub.f32 %v4380_v23, %v1572_v46  ;;  %v1630_v21 = vsub.f32 %v4361_v41, %v1536_v61  ;;  %v1568_v44 = vrot.slane %v4461_v25, %v4419_v2 }
 0x2eb   : > { %v4495_v22 = vpop.eup %3631  ;;  %3657 = vpow2.f32 %v1667_v30  ;;  %v1679_v43 = vmul.f32 1.442695, %v1628_v16  ;;  %v1576_v41 = vrot.slane %v4461_v25, %v4427_v34 }
 0x2ec   : > { %v4499_v4 = vpop.eup %3633  ;;  %1810 = vperm.xlu0 %3613, %v4495_v22   ;;  %3659 = vpow2.f32 %v1681_v3  ;;  %v1701_v37 = vmul.f32 1.442695, %v1639_v14  ;;  %v1683_v23 = vmul.f32 1.442695, %v1630_v21  ;;  %v1638_v60 = vsub.f32 %v4376_v8, %v1568_v44 }
 0x2ed   : > { %1813 = vperm.xlu1 %3614, %v4499_v4   ;;  %v4506_v26 = vpop.eup %3635  ;;  %3661 = vpow2.f32 %v1675_v58  ;;  %v1640_v50 = vsub.f32 %v4389_v59, %v1576_v41 }
 0x2ee   : > { %v4511_v29 = vpop.eup %3637  ;;  %3663 = vpow2.f32 %v1685_v19  ;;  %v1699_v10 = vmul.f32 1.442695, %v1638_v60  ;;  %v1833_v19 = vadd.s32 1, %v3864_v42 }
 0x2ef   : > { %v4518_v7 = vpop.eup %3639  ;;  %3665 = vpow2.f32 %v1677_v12  ;;  %v1703_v25 = vmul.f32 1.442695, %v1640_v50 }
 0x2f0   : > { %1822 = vperm.xlu0 %3613, %v4506_v26   ;;  %v4523_v11 = vpop.eup %3641  ;;  %3667 = vpow2.f32 %v1687_v1  ;;  %v4603_v61 = vsub.s32 %v1833_v19, %v3964_v47 }
 0x2f1   : > { %1816 = vperm.xlu1 %3614, %v4511_v29   ;;  %v4530_v28 = vpop.eup %3643  ;;  %3669 = vpow2.f32 %v1679_v43 }
 0x2f2   : > { %v4535_v5 = vpop.eup %3645  ;;  %3671 = vpow2.f32 %v1701_v37 }
 0x2f3   : > { %v4542_v56 = vpop.eup %3647  ;;  %3673 = vpow2.f32 %v1683_v23 }
 0x2f4   : > { %1762 = vperm.xlu0 %3613, %v4518_v7   ;;  %v4547_v62 = vpop.eup %3649  ;;  %3675 = vpow2.f32 %v1699_v10 }
 0x2f5   : > { %1819 = vperm.xlu1 %3614, %v4523_v11   ;;  %v4552_v13 = vpop.eup %3651  ;;  %3677 = vpow2.f32 %v1703_v25 }
 0x2f6   : > { %v4557_v20 = vpop.eup %3653 }
 0x2f7   : > { %v4561_v63 = vpop.eup %3655 }
 0x2f8   : > { %1774 = vperm.xlu0 %3613, %v4530_v28   ;;  %v4566_v52 = vpop.eup %3657 }
 0x2f9   : > { %1765 = vperm.xlu1 %3614, %v4535_v5   ;;  %v4570_v30 = vpop.eup %3659 }
 0x2fa   : > { %v4573_v18 = vpop.eup %3661 }
 0x2fb   : > { %v4577_v8 = vpop.eup %3663 }
 0x2fc   : > { %1780 = vperm.xlu0 %3613, %v4542_v56   ;;  %v4579_v0 = vpop.eup %3665 }
 0x2fd   : > { %1768 = vperm.xlu1 %3614, %v4547_v62   ;;  %v4583_v3 = vpop.eup %3667 }
 0x2fe   : > { %v4585_v59 = vpop.eup %3669 }
 0x2ff   : > { %v4589_v40 = vpop.eup %3671 }
 0x300   : > { %1783 = vperm.xlu0 %3613, %v4552_v13   ;;  %v4591_v35 = vpop.eup %3673 }
 0x301   : > { %1771 = vperm.xlu1 %3614, %v4557_v20   ;;  %v4595_v58 = vpop.eup %3675 }
 0x302   : > { %v4598_v32 = vpop.eup %3677 }
 0x304   : > { %1786 = vperm.xlu0 %3613, %v4561_v63  }
 0x305   : > { %1777 = vperm.xlu1 %3614, %v4566_v52  }
 0x308   : > { %1798 = vperm.xlu0 %3613, %v4570_v30  }
 0x309   : > { %1789 = vperm.xlu1 %3614, %v4573_v18  }
 0x30c   : > { %1804 = vperm.xlu0 %3613, %v4577_v8  }
 0x30d   : > { %1792 = vperm.xlu1 %3614, %v4579_v0  }
 0x310   : > { %1807 = vperm.xlu0 %3613, %v4583_v3  }
 0x311   : > { %1795 = vperm.xlu1 %3614, %v4585_v59  }
 0x314   : > { %1828 = vperm.xlu0 %3613, %v4589_v40  }
 0x315   : > { %1801 = vperm.xlu1 %3614, %v4591_v35  }
 0x319   : > { %1825 = vperm.xlu1 %3614, %v4595_v58  }
 0x31d   : > { %1831 = vperm.xlu1 %3614, %v4598_v32  }
 0x33e   : > { %v1739_v46 = vpop.permute.xlu1 %1738 }
 0x33f   : > { %v1742_v16 = vpop.permute.xlu0 %1741  ;;  %v1837_v1 = vrot.slane %v1739_v46, %v4603_v61 }
 0x340   : > { %v1841_v14 = vrot.slane %v1742_v16, %v4603_v61 }
 0x342   : > { %v1745_v12 = vpop.permute.xlu1 %1744  ;;  %v1962_v37 = vsel %vm1393_vm11, %v1841_v14, %v1837_v1 }
 0x343   : > { %v1751_v21 = vpop.permute.xlu0 %1750  ;;  %v1845_v43 = vrot.slane %v1745_v12, %v4603_v61 }
 0x344   : > { %v1853_v60 = vrot.slane %v1751_v21, %v4603_v61 }
 0x345   : > { %v1963_v42 = vsel %vm1395_vm12, %v1845_v43, %v1962_v37 }
 0x346   : > { %v1748_v44 = vpop.permute.xlu1 %1747 }
 0x347   : > { %v1849_v23 = vrot.slane %v1748_v44, %v4603_v61  ;;  %v1757_v41 = vpop.permute.xlu0 %1756 }
 0x348   : > { %v1861_v19 = vrot.slane %v1757_v41, %v4603_v61 }
 0x349   : > { %v1964_v47 = vsel %vm1397_vm1, %v1849_v23, %v1963_v42 }
 0x34a   : > { %v1754_v50 = vpop.permute.xlu1 %1753  ;;  %v1965_v46 = vsel %vm1399_vm2, %v1853_v60, %v1964_v47 }
 0x34b   : > { %v1857_v10 = vrot.slane %v1754_v50, %v4603_v61  ;;  %v1760_v25 = vpop.permute.xlu0 %1759 }
 0x34c   : > { %v1865_v12 = vrot.slane %v1760_v25, %v4603_v61 }
 0x34d   : > { %v1966_v16 = vsel %vm1401_vm3, %v1857_v10, %v1965_v46 }
 0x34e   : > { %v1967_v1 = vsel %vm1403_vm5, %v1861_v19, %v1966_v16 }
 0x34f   : > { %v1968_v14 = vsel %vm1405_vm8, %v1865_v12, %v1967_v1 }
 0x350   : > { %v1995_v43 = vsel %vm1994_vm13, %v1968_v14, 0.0 }
 0x351   : > { %1996 = vadd.xlane.f32.xlu0 %v1995_v43 }
 0x367   : > { %v1811_v21 = vpop.permute.xlu0 %1810 }
 0x368   : > { %v1814_v44 = vpop.permute.xlu1 %1813 }
 0x36b   : > { %v4621_v37 = vpop.permute.xlu0 %1822 }
 0x36c   : > { %v1817_v23 = vpop.permute.xlu1 %1816 }
 0x36f   : > { %v1763_v41 = vpop.permute.xlu0 %1762 }
 0x370   : > { %v1820_v42 = vpop.permute.xlu1 %1819  ;;  %v1869_v46 = vrot.slane %v1763_v41, %v4603_v61 }
 0x373   : > { %v1775_v47 = vpop.permute.xlu0 %1774 }
 0x374   : > { %v1766_v60 = vpop.permute.xlu1 %1765  ;;  %v1885_v57 = vrot.slane %v1775_v47, %v4603_v61 }
 0x375   : > { %v1873_v25 = vrot.slane %v1766_v60, %v4603_v61 }
 0x377   : > { %v1781_v50 = vpop.permute.xlu0 %1780  ;;  %v1969_v1 = vsel %vm1393_vm11, %v1873_v25, %v1869_v46 }
 0x378   : > { %v1769_v10 = vpop.permute.xlu1 %1768 }
 0x379   : > { %v1877_v19 = vrot.slane %v1769_v10, %v4603_v61  ;;  %v1893_v10 = vrot.slane %v1781_v50, %v4603_v61 }
 0x37b   : > { %v1784_v16 = vpop.permute.xlu0 %1783  ;;  %v1970_v43 = vsel %vm1395_vm12, %v1877_v19, %v1969_v1 }
 0x37c   : > { %v1772_v12 = vpop.permute.xlu1 %1771  ;;  %v1897_v49 = vrot.slane %v1784_v16, %v4603_v61  ;;  %v1937_v16 = vrot.slane %v1814_v44, %v4603_v61 }
 0x37d   : > { %v1881_v14 = vrot.slane %v1772_v12, %v4603_v61 }
 0x37f   : > { %v1971_v36 = vsel %vm1397_vm1, %v1881_v14, %v1970_v43  ;;  %v1787_v54 = vpop.permute.xlu0 %1786 }
 0x380   : > { %v1778_v51 = vpop.permute.xlu1 %1777  ;;  %v1972_v41 = vsel %vm1399_vm2, %v1885_v57, %v1971_v36  ;;  %v1901_v57 = vrot.slane %v1787_v54, %v4603_v61 }
 0x381   : > { %v1889_v60 = vrot.slane %v1778_v51, %v4603_v61 }
 0x383   : > { %v1973_v25 = vsel %vm1401_vm3, %v1889_v60, %v1972_v41  ;;  %v1799_v46 = vpop.permute.xlu0 %1798  ;;  %v1933_v60 = vrot.slane %v1811_v21, %v4603_v61  ;;  %v1941_v41 = vrot.slane %v1817_v23, %v4603_v61 }
 0x384   : > { %v1790_v12 = vpop.permute.xlu1 %1789  ;;  %v1974_v19 = vsel %vm1403_vm5, %v1893_v10, %v1973_v25  ;;  %v1917_v54 = vrot.slane %v1799_v46, %v4603_v61  ;;  %v1949_v46 = vrot.slane %v4621_v37, %v4603_v61 }
 0x385   : > { %v1975_v1 = vsel %vm1405_vm8, %v1897_v49, %v1974_v19  ;;  %v1905_v51 = vrot.slane %v1790_v12, %v4603_v61  ;;  %v1945_v12 = vrot.slane %v1820_v42, %v4603_v61  ;;  %v1983_v44 = vsel %vm1393_vm11, %v1937_v16, %v1933_v60 }
 0x386   : > { %v1998_v14 = vsel %vm1994_vm13, %v1975_v1, 0.0 }
 0x387   : > { %1999 = vadd.xlane.f32.xlu1 %v1998_v14  ;;  %v1805_v43 = vpop.permute.xlu0 %1804  ;;  %v1976_v10 = vsel %vm1393_vm11, %v1905_v51, %v1901_v57 }
 0x388   : > { %v1793_v47 = vpop.permute.xlu1 %1792  ;;  %v1925_v51 = vrot.slane %v1805_v43, %v4603_v61  ;;  %v3437_v43 = vld [vmem:[%s5101_s2] ss:$0 sm:$0xff] }
 0x389   : > { %v1909_v50 = vrot.slane %v1793_v47, %v4603_v61  ;;  %v1984_v47 = vsel %vm1395_vm12, %v1941_v41, %v1983_v44 }
 0x38b   : > { %v1977_v25 = vsel %vm1395_vm12, %v1909_v50, %v1976_v10  ;;  %v1808_v1 = vpop.permute.xlu0 %1807  ;;  %v1985_v50 = vsel %vm1397_vm1, %v1945_v12, %v1984_v47 }
 0x38c   : > { %v1796_v36 = vpop.permute.xlu1 %1795  ;;  %v1929_v42 = vrot.slane %v1808_v1, %v4603_v61  ;;  %v1986_v41 = vsel %vm1399_vm2, %v1949_v46, %v1985_v50 }
 0x38d   : > { %v1913_v49 = vrot.slane %v1796_v36, %v4603_v61 }
 0x38f   : > { %v1978_v19 = vsel %vm1397_vm1, %v1913_v49, %v1977_v25  ;;  %v1829_v60 = vpop.permute.xlu0 %1828 }
 0x390   : > { %v1802_v14 = vpop.permute.xlu1 %1801  ;;  %v1979_v23 = vsel %vm1399_vm2, %v1917_v54, %v1978_v19  ;;  %v1957_v37 = vrot.slane %v1829_v60, %v4603_v61 }
 0x391   : > { %v1921_v21 = vrot.slane %v1802_v14, %v4603_v61 }
 0x393   : > { %v1980_v57 = vsel %vm1401_vm3, %v1921_v21, %v1979_v23 }
 0x394   : > { %v1826_v36 = vpop.permute.xlu1 %1825  ;;  %v1981_v16 = vsel %vm1403_vm5, %v1925_v51, %v1980_v57 }
 0x395   : > { %v1953_v10 = vrot.slane %v1826_v36, %v4603_v61  ;;  %v1982_v49 = vsel %vm1405_vm8, %v1929_v42, %v1981_v16 }
 0x396   : > { %v2001_v25 = vsel %vm1994_vm13, %v1982_v49, 0.0 }
 0x397   : > { %v1987_v12 = vsel %vm1401_vm3, %v1953_v10, %v1986_v41  ;;  %2002 = vadd.xlane.f32.xlu0 %v2001_v25 }
 0x398   : > { %v1832_v19 = vpop.permute.xlu1 %1831  ;;  %2243 = vbcast.lane.b32.xlu1 %v3437_v43, 511  ;;  %v1988_v54 = vsel %vm1403_vm5, %v1957_v37, %v1987_v12 }
 0x399   : > { %v1961_v1 = vrot.slane %v1832_v19, %v4603_v61 }
 0x39b   : > { %v1989_v14 = vsel %vm1405_vm8, %v1961_v1, %v1988_v54 }
 0x39c   : > { %v2004_v44 = vsel %vm1994_vm13, %v1989_v14, 0.0 }
 0x39d   : > { %2005 = vadd.xlane.f32.xlu0 %v2004_v44 }
 0x3da   : > { %v1997_v21 = vpop.xlane.xlu0 %1996 }
 0x3db   : > { %v2014_v47 = vrot.slane %v1997_v21, %v3967_v48  ;;  %v2018_v51 = vrot.slane %v1997_v21, %v4401_v24  ;;  %v2022_v23 = vrot.slane %v1997_v21, %v4404_v38  ;;  %v2026_v50 = vrot.slane %v1997_v21, %v4410_v6 }
 0x3dc   : > { %v2030_v61 = vrot.slane %v1997_v21, %v4407_v17  ;;  %v2034_v42 = vrot.slane %v1997_v21, %v4419_v2  ;;  %v2038_v57 = vrot.slane %v1997_v21, %v4413_v39  ;;  %v2042_v36 = vrot.slane %v1997_v21, %v4427_v34 }
 0x3dd   : > { %3679 = vrcp.f32 %v2014_v47 }
 0x3de   : > { %3681 = vrcp.f32 %v2018_v51 }
 0x3df   : > { %3683 = vrcp.f32 %v2022_v23 }
 0x3e0   : > { %3685 = vrcp.f32 %v2026_v50 }
 0x3e1   : > { %3687 = vrcp.f32 %v2030_v61 }
 0x3e2   : > { %3689 = vrcp.f32 %v2034_v42 }
 0x3e3   : > { %3691 = vrcp.f32 %v2038_v57 }
 0x3e4   : > { %3693 = vrcp.f32 %v2042_v36 }
 0x3ea   : > { %v3680_v46 = vpop.eup %3679 }
 0x3eb   : > { %v3682_v16 = vpop.eup %3681  ;;  %v2172_v43 = vmul.f32 %v3680_v46, %v4437_v45 }
 0x3ec   : > { %v3684_v10 = vpop.eup %3683  ;;  %v2174_v49 = vmul.f32 %v3682_v16, %v4439_v55 }
 0x3ed   : > { %v3686_v41 = vpop.eup %3685  ;;  %v2176_v1 = vmul.f32 %v3684_v10, %v4443_v27 }
 0x3ee   : > { %v3688_v19 = vpop.eup %3687  ;;  %v2178_v54 = vmul.f32 %v3686_v41, %v4449_v53 }
 0x3ef   : > { %v3690_v14 = vpop.eup %3689  ;;  %v2180_v45 = vmul.f32 %v3688_v19, %v4445_v15 }
 0x3f0   : > { %v2182_v21 = vmul.f32 %v3690_v14, %v4455_v33  ;;  %v3692_v47 = vpop.eup %3691 }
 0x3f1   : > { %v2184_v27 = vmul.f32 %v3692_v47, %v4451_v31  ;;  %v3694_v53 = vpop.eup %3693 }
 0x3f2   : > { %v2186_v42 = vmul.f32 %v3694_v53, %v4457_v9 }
 0x410   : > { %v4683_v60 = vpop.xlane.xlu1 %1999 }
 0x411   : > { %v2046_v36 = vrot.slane %v4683_v60, %v3967_v48  ;;  %v2062_v10 = vrot.slane %v4683_v60, %v4407_v17  ;;  %v2054_v41 = vrot.slane %v4683_v60, %v4404_v38  ;;  %v2058_v19 = vrot.slane %v4683_v60, %v4410_v6 }
 0x414   : > { %v4687_v25 = vpop.permute.xlu1 %2243 }
 0x415   : > { %v2247_v12 = vmul.f32 %v4687_v25, %v2174_v49  ;;  %v2246_v37 = vmul.f32 %v4687_v25, %v2172_v43  ;;  %v2248_v44 = vmul.f32 %v4687_v25, %v2176_v1  ;;  %v2249_v55 = vmul.f32 %v4687_v25, %v2178_v54 }
 0x416   : > { %v2250_v51 = vmul.f32 %v4687_v25, %v2180_v45  ;;  %v2251_v23 = vmul.f32 %v4687_v25, %v2182_v21  ;;  %v2252_v50 = vmul.f32 %v4687_v25, %v2184_v27  ;;  %v2253_v15 = vmul.f32 %v4687_v25, %v2186_v42 }
 0x417   : > { %2285 = vperm.xlu1 %3614, %v2247_v12   ;;  %2280 = vperm.xlu0 %3613, %v2246_v37   ;;  %v2050_v49 = vrot.slane %v4683_v60, %v4401_v24  ;;  %v2070_v43 = vrot.slane %v4683_v60, %v4413_v39  ;;  %v2074_v12 = vrot.slane %v4683_v60, %v4427_v34 }
 0x41b   : > { %2290 = vperm.xlu1 %3614, %v2248_v44   ;;  %2295 = vperm.xlu0 %3613, %v2249_v55  }
 0x41f   : > { %2300 = vperm.xlu1 %3614, %v2250_v51   ;;  %2305 = vperm.xlu0 %3613, %v2251_v23   ;;  %v2066_v51 = vrot.slane %v4683_v60, %v4419_v2 }
 0x420   : > { %v4701_v61 = vpop.xlane.xlu0 %2002 }
 0x421   : > { %v2078_v45 = vrot.slane %v4701_v61, %v3967_v48  ;;  %v2094_v53 = vrot.slane %v4701_v61, %v4407_v17  ;;  %v2082_v60 = vrot.slane %v4701_v61, %v4401_v24 }
 0x423   : > { %2310 = vperm.xlu1 %3614, %v2252_v50  }
 0x426   : > { %v4705_v33 = vpop.xlane.xlu0 %2005 }
 0x427   : > { %v2110_v57 = vrot.slane %v4705_v33, %v3967_v48  ;;  %2315 = vperm.xlu1 %3614, %v2253_v15   ;;  %v2114_v46 = vrot.slane %v4705_v33, %v4401_v24  ;;  %v2118_v31 = vrot.slane %v4705_v33, %v4404_v38  ;;  %v2126_v9 = vrot.slane %v4705_v33, %v4407_v17 }
 0x428   : > { %v2122_v16 = vrot.slane %v4705_v33, %v4410_v6  ;;  %v2102_v17 = vrot.slane %v4701_v61, %v4413_v39 }
 0x429   : > { %3695 = vrcp.f32 %v2110_v57 }
 0x42a   : > { %3697 = vrcp.f32 %v2114_v46 }
 0x42b   : > { %3699 = vrcp.f32 %v2118_v31 }
 0x42c   : > { %3701 = vrcp.f32 %v2046_v36  ;;  %v2086_v36 = vrot.slane %v4701_v61, %v4404_v38  ;;  %v5234_v38 = vld [vmem:[#allocation25_spill] sm:$0xff] }
 0x42d   : > { %3703 = vrcp.f32 %v2126_v9 }
 0x42e   : > { %3705 = vrcp.f32 %v2122_v16 }
 0x42f   : > { %3707 = vrcp.f32 %v2062_v10  ;;  %v2106_v10 = vrot.slane %v4701_v61, %v4427_v34 }
 0x430   : > { %3709 = vrcp.f32 %v2050_v49 }
 0x431   : > { %3711 = vrcp.f32 %v2070_v43 }
 0x432   : > { %3713 = vrcp.f32 %v2054_v41  ;;  %v2090_v41 = vrot.slane %v4701_v61, %v4410_v6  ;;  %v2098_v6 = vrot.slane %v4701_v61, %v4419_v2 }
 0x433   : > { %3715 = vrcp.f32 %v2074_v12 }
 0x434   : > { %3717 = vrcp.f32 %v2058_v19  ;;  %v2134_v19 = vrot.slane %v4705_v33, %v4413_v39 }
 0x435   : > { %3719 = vrcp.f32 %v2078_v45 }
 0x436   : > { %v3696_v37 = vpop.eup %3695  ;;  %3721 = vrcp.f32 %v2066_v51 }
 0x437   : > { %v3698_v1 = vpop.eup %3697  ;;  %v2220_v54 = vmul.f32 %v3696_v37, %v4495_v22  ;;  %3723 = vrcp.f32 %v2094_v53 }
 0x438   : > { %v3700_v14 = vpop.eup %3699  ;;  %v2222_v44 = vmul.f32 %v3698_v1, %v4499_v4  ;;  %3725 = vrcp.f32 %v2082_v60 }
 0x439   : > { %v3702_v55 = vpop.eup %3701  ;;  %v2270_v21 = vmul.f32 %v4687_v25, %v2220_v54  ;;  %v2224_v27 = vmul.f32 %v3700_v14, %v4511_v29  ;;  %3727 = vrcp.f32 %v2102_v17 }
 0x43a   : > { %v3704_v47 = vpop.eup %3703  ;;  %v2271_v23 = vmul.f32 %v4687_v25, %v2222_v44  ;;  %v2188_v42 = vmul.f32 %v3702_v55, %v4518_v7  ;;  %3729 = vrcp.f32 %v2086_v36 }
 0x43b   : > { %v3706_v22 = vpop.eup %3705  ;;  %2400 = vperm.xlu1 %3614, %v2270_v21   ;;  %v2228_v4 = vmul.f32 %v3704_v47, %v4506_v26  ;;  %v2272_v29 = vmul.f32 %v4687_v25, %v2224_v27  ;;  %3731 = vrcp.f32 %v2106_v10  ;;  %v2972_v10 = vld [vmem:[%s5102_s3 + $0x60] sm:$0xff] }
 0x43c   : > { %2405 = vperm.xlu0 %3613, %v2271_v23   ;;  %v3708_v15 = vpop.eup %3707  ;;  %v2226_v57 = vmul.f32 %v3706_v22, %v4523_v11  ;;  %v2254_v26 = vmul.f32 %v4687_v25, %v2188_v42  ;;  %3733 = vrcp.f32 %v2090_v41  ;;  %v2966_v41 = vld [vmem:[%s5102_s3 + $0x30] sm:$0xff] }
 0x43d   : > { %v2274_v50 = vmul.f32 %v4687_v25, %v2228_v4  ;;  %v3710_v46 = vpop.eup %3709  ;;  %v2196_v7 = vmul.f32 %v3708_v15, %v4530_v28  ;;  %3735 = vrcp.f32 %v2134_v19 }
 0x43e   : > { %v3712_v31 = vpop.eup %3711  ;;  %v2273_v9 = vmul.f32 %v4687_v25, %v2226_v57  ;;  %v2190_v11 = vmul.f32 %v3710_v46, %v4535_v5  ;;  %3737 = vrcp.f32 %v2098_v6  ;;  %v5212_v6 = vld [vmem:[#allocation4_spill] sm:$0xff] }
 0x43f   : > { %2420 = vperm.xlu1 %3614, %v2274_v50   ;;  %v3714_v16 = vpop.eup %3713  ;;  %v2258_v49 = vmul.f32 %v4687_v25, %v2196_v7  ;;  %v2200_v28 = vmul.f32 %v3712_v31, %v4542_v56 }
 0x440   : > { %2410 = vperm.xlu0 %3613, %v2272_v29   ;;  %v3716_v43 = vpop.eup %3715  ;;  %v2255_v12 = vmul.f32 %v4687_v25, %v2190_v11  ;;  %v2192_v5 = vmul.f32 %v3714_v16, %v4547_v62  ;;  %v2975_v11 = vld [vmem:[%s5102_s3 + $0x78] sm:$0xff]  ;;  %v2973_v16 = vld [vmem:[%s5102_s3 + $0x68] sm:$0xff] }
 0x441   : > { %v3718_v37 = vpop.eup %3717  ;;  %v2260_v1 = vmul.f32 %v4687_v25, %v2200_v28  ;;  %v2202_v56 = vmul.f32 %v3716_v43, %v4552_v13  ;;  %v2130_v13 = vrot.slane %v4705_v33, %v4419_v2  ;;  %v2969_v28 = vld [vmem:[%s5102_s3 + $0x48] sm:$0xff]  ;;  %v2967_v43 = vld [vmem:[%s5102_s3 + $0x38] sm:$0xff] }
 0x442   : > { %v3720_v54 = vpop.eup %3719  ;;  %v2256_v14 = vmul.f32 %v4687_v25, %v2192_v5  ;;  %v2194_v62 = vmul.f32 %v3718_v37, %v4557_v20  ;;  %v2963_v5 = vld [vmem:[%s5102_s3 + $0x18] sm:$0xff]  ;;  %v2961_v37 = vld [vmem:[%s5102_s3 + $0x8] sm:$0xff] }
 0x443   : > { %2320 = vperm.xlu1 %3614, %v2254_v26   ;;  %v3722_v44 = vpop.eup %3721  ;;  %v2261_v55 = vmul.f32 %v4687_v25, %v2202_v56  ;;  %v2204_v39 = vmul.f32 %v3720_v54, %v4561_v63  ;;  %v2138_v63 = vrot.slane %v4705_v33, %v4427_v34  ;;  %3739 = vrcp.f32 %v2130_v13  ;;  %v5211_v56 = vld [vmem:[#allocation3_spill] sm:$0xff] }
 0x444   : > { %2415 = vperm.xlu0 %3613, %v2273_v9   ;;  %v3724_v45 = vpop.eup %3723  ;;  %v2257_v61 = vmul.f32 %v4687_v25, %v2194_v62  ;;  %v2198_v21 = vmul.f32 %v3722_v44, %v4566_v52  ;;  %v2981_v9 = vld [vmem:[%s5102_s3 + $0xa8] sm:$0xff] }
 0x445   : > { %v3726_v47 = vpop.eup %3725  ;;  %v2262_v20 = vmul.f32 %v4687_v25, %v2204_v39  ;;  %v2212_v51 = vmul.f32 %v3724_v45, %v4570_v30  ;;  %3741 = vrcp.f32 %v2138_v63 }
 0x446   : > { %v3728_v23 = vpop.eup %3727  ;;  %v2259_v27 = vmul.f32 %v4687_v25, %v2198_v21  ;;  %v2206_v2 = vmul.f32 %v3726_v47, %v4573_v18  ;;  %v5214_v47 = vld [vmem:[#allocation5_spill] sm:$0xff] }
 0x447   : > { %2340 = vperm.xlu1 %3614, %v2258_v49   ;;  %v3730_v22 = vpop.eup %3729  ;;  %v2266_v52 = vmul.f32 %v4687_v25, %v2212_v51  ;;  %v2216_v4 = vmul.f32 %v3728_v23, %v4577_v8  ;;  %v2970_v49 = vld [vmem:[%s5102_s3 + $0x50] sm:$0xff] }
 0x448   : > { %2325 = vperm.xlu0 %3613, %v2255_v12   ;;  %v3732_v53 = vpop.eup %3731  ;;  %v2263_v30 = vmul.f32 %v4687_v25, %v2206_v2  ;;  %v2208_v50 = vmul.f32 %v3730_v22, %v4579_v0  ;;  %v2964_v12 = vld [vmem:[%s5102_s3 + $0x20] sm:$0xff] }
 0x449   : > { %v3734_v42 = vpop.eup %3733  ;;  %v2268_v34 = vmul.f32 %v4687_v25, %v2216_v4  ;;  %v2218_v18 = vmul.f32 %v3732_v53, %v4583_v3 }
 0x44a   : > { %v3736_v33 = vpop.eup %3735  ;;  %v2264_v15 = vmul.f32 %v4687_v25, %v2208_v50  ;;  %v2210_v60 = vmul.f32 %v3734_v42, %v4585_v59  ;;  %v5215_v50 = vld [vmem:[#allocation8_spill] sm:$0xff] }
 0x44b   : > { %2350 = vperm.xlu1 %3614, %v2260_v1   ;;  %v3738_v29 = vpop.eup %3737  ;;  %v2269_v8 = vmul.f32 %v4687_v25, %v2218_v18  ;;  %v2232_v57 = vmul.f32 %v3736_v33, %v4589_v40 }
 0x44c   : > { %2330 = vperm.xlu0 %3613, %v2256_v14   ;;  %v2265_v0 = vmul.f32 %v4687_v25, %v2210_v60  ;;  %v2214_v46 = vmul.f32 %v3738_v29, %v4591_v35  ;;  %v2982_v35 = vld [vmem:[%s5102_s3 + $0xb0] sm:$0xff] }
 0x44d   : > { %v2276_v3 = vmul.f32 %v4687_v25, %v2232_v57  ;;  %3029 = vmatprep.subr.mxu1 %v2982_v35 }
 0x44e   : > { %v2267_v26 = vmul.f32 %v4687_v25, %v2214_v46  ;;  %3030 = vmatpush1.msra.mxu1 %v2981_v9 }
 0x44f   : > { %2355 = vperm.xlu1 %3614, %v2261_v55  }
 0x450   : > { %2335 = vperm.xlu0 %3613, %v2257_v61   ;;  %v3740_v17 = vpop.eup %3739  ;;  %v5213_v61 = vld [vmem:[#allocation6_spill] sm:$0xff] }
 0x451   : > { %v2230_v59 = vmul.f32 %v3740_v17, %v4595_v58  ;;  %v2979_v58 = vld [vmem:[%s5102_s3 + $0x98] sm:$0xff] }
 0x452   : > { %v3742_v7 = vpop.eup %3741  ;;  %3031 = vmatprep.subr.mxu1 %v2979_v58 }
 0x453   : > { %2360 = vperm.xlu1 %3614, %v2262_v20   ;;  %v2275_v31 = vmul.f32 %v4687_v25, %v2230_v59  ;;  %v2234_v40 = vmul.f32 %v3742_v7, %v4598_v32  ;;  %v2978_v32 = vld [vmem:[%s5102_s3 + $0x90] sm:$0xff] }
 0x454   : > { %2345 = vperm.xlu0 %3613, %v2259_v27   ;;  %3032 = vmatpush1.msra.mxu1 %v2978_v32 }
 0x455   : > { %v2277_v36 = vmul.f32 %v4687_v25, %v2234_v40  ;;  %v2976_v25 = vld [vmem:[%s5102_s3 + $0x80] sm:$0xff] }
 0x456   : > { %3033 = vmatprep.subr.mxu1 %v2976_v25 }
 0x457   : > { %2380 = vperm.xlu1 %3614, %v2266_v52   ;;  %3034 = vmatpush1.msra.mxu1 %v2975_v11 }
 0x458   : > { %2365 = vperm.xlu0 %3613, %v2263_v30   ;;  %3035 = vmatprep.subr.mxu1 %v2973_v16 }
 0x459   : > { %3036 = vmatpush1.msra.mxu1 %v2972_v10 }
 0x45a   : > { %3037 = vmatprep.subr.mxu1 %v2970_v49 }
 0x45b   : > { %2390 = vperm.xlu1 %3614, %v2268_v34   ;;  %3038 = vmatpush1.msra.mxu1 %v2969_v28  ;;  %v5216_v34 = vld [vmem:[#allocation7_spill] sm:$0xff] }
 0x45c   : > { %2370 = vperm.xlu0 %3613, %v2264_v15   ;;  %3039 = vmatprep.subr.mxu1 %v2967_v43 }
 0x45d   : > { %3040 = vmatpush1.msra.mxu1 %v2966_v41 }
 0x45e   : > { %3041 = vmatprep.subr.mxu1 %v2964_v12  ;;  %v5218_v12 = vld [vmem:[#allocation9_spill] sm:$0xff] }
 0x45f   : > { %2395 = vperm.xlu1 %3614, %v2269_v8   ;;  %3042 = vmatpush1.msra.mxu1 %v2963_v5 }
 0x460   : > { %2375 = vperm.xlu0 %3613, %v2265_v0   ;;  %3043 = vmatprep.subr.mxu1 %v2961_v37 }
 0x463   : > { %2430 = vperm.xlu1 %3614, %v2276_v3  }
 0x464   : > { %2385 = vperm.xlu0 %3613, %v2267_v26  }
 0x468   : > { %2425 = vperm.xlu0 %3613, %v2275_v31   ;;  %v5217_v31 = vld [vmem:[#allocation10_spill] sm:$0xff] }
 0x46c   : > { %2435 = vperm.xlu0 %3613, %v2277_v36  }
 0x492   : > { %v2286_v19 = vpop.permute.xlu1 %2285  ;;  %v2281_v1 = vpop.permute.xlu0 %2280 }
 0x493   : > { %v2439_v54 = vmul.f32 %v5211_v56, %v2286_v19  ;;  %v2438_v14 = vmul.f32 %v2281_v1, %v5212_v6 }
 0x495   : > { %v2503_v62 = vrot.slane %v2439_v54, 1  ;;  %v2502_v44 = vrot.slane %v2438_v14, 1 }
 0x496   : > { %v2291_v55 = vpop.permute.xlu1 %2290  ;;  %v2296_v39 = vpop.permute.xlu0 %2295 }
 0x497   : > { %v2574_v45 = vsel %vm2566_vm6, %v2503_v62, 0.0  ;;  %v2567_v13 = vsel %vm2566_vm6, %v2502_v44, 0.0  ;;  %v2440_v21 = vmul.f32 %v2291_v55, %v5213_v61  ;;  %v2441_v20 = vmul.f32 %v5214_v47, %v2296_v39 }
 0x498   : > { %v2575_v51 = vrot.slane %v2574_v45, 4  ;;  %v2568_v23 = vrot.slane %v2567_v13, 4 }
 0x499   : > { %v2504_v63 = vrot.slane %v2440_v21, 1  ;;  %v2505_v27 = vrot.slane %v2441_v20, 1 }
 0x49a   : > { %v2576_v2 = vadd.f32 %v2575_v51, %v2574_v45  ;;  %v2569_v22 = vadd.f32 %v2568_v23, %v2567_v13  ;;  %v2301_v52 = vpop.permute.xlu1 %2300  ;;  %v2306_v4 = vpop.permute.xlu0 %2305 }
 0x49b   : > { %v2581_v53 = vsel %vm2566_vm6, %v2504_v63, 0.0  ;;  %v2588_v30 = vsel %vm2566_vm6, %v2505_v27, 0.0  ;;  %v2442_v42 = vmul.f32 %v2301_v52, %v5215_v50  ;;  %v2443_v18 = vmul.f32 %v5216_v34, %v2306_v4  ;;  %v2960_v63 = vld [vmem:[%s5102_s3] sm:$0xff] }
 0x49c   : > { %v2577_v33 = vrot.slane %v2576_v2, 2  ;;  %v2570_v15 = vrot.slane %v2569_v22, 2  ;;  %v2582_v60 = vrot.slane %v2581_v53, 4  ;;  %v2589_v29 = vrot.slane %v2588_v30, 4  ;;  %3044 = vmatpush1.msra.mxu1 %v2960_v63 }
 0x49d   : > { %v2506_v8 = vrot.slane %v2442_v42, 1  ;;  %v2507_v57 = vrot.slane %v2443_v18, 1 }
 0x49e   : > { %v2578_v0 = vadd.f32 %v2577_v33, %v2576_v2  ;;  %v2571_v46 = vadd.f32 %v2570_v15, %v2569_v22  ;;  %v2583_v17 = vadd.f32 %v2582_v60, %v2581_v53  ;;  %v2590_v3 = vadd.f32 %v2589_v29, %v2588_v30  ;;  %v2311_v26 = vpop.permute.xlu1 %2310 }
 0x49f   : > { %v2595_v59 = vsel %vm2566_vm6, %v2506_v8, 0.0  ;;  %v2602_v7 = vsel %vm2566_vm6, %v2507_v57, 0.0  ;;  %v2444_v40 = vmul.f32 %v2311_v26, %v5217_v31 }
 0x4a0   : > { %v2579_v36 = vrot.slane %v2578_v0, 1  ;;  %v2584_v35 = vrot.slane %v2583_v17, 2  ;;  %v2591_v9 = vrot.slane %v2590_v3, 2  ;;  %v2572_v58 = vrot.slane %v2571_v46, 1 }
 0x4a1   : > { %v2596_v32 = vrot.slane %v2595_v59, 4  ;;  %v2603_v25 = vrot.slane %v2602_v7, 4  ;;  %v2508_v11 = vrot.slane %v2444_v40, 1 }
 0x4a2   : > { %v2585_v16 = vadd.f32 %v2584_v35, %v2583_v17  ;;  %v2592_v10 = vadd.f32 %v2591_v9, %v2590_v3  ;;  %v2316_v49 = vpop.permute.xlu1 %2315  ;;  %v2580_v37 = vadd.f32 %v2579_v36, %v2578_v0  ;;  %v2573_v54 = vadd.f32 %v2572_v58, %v2571_v46  ;;  %v5220_v35 = vld [vmem:[#allocation18_spill] sm:$0xff] }
 0x4a3   : > { %v2597_v28 = vadd.f32 %v2596_v32, %v2595_v59  ;;  %v2604_v43 = vadd.f32 %v2603_v25, %v2602_v7  ;;  %v2609_v41 = vsel %vm2566_vm6, %v2508_v11, 0.0  ;;  %v2445_v5 = vmul.f32 %v5218_v12, %v2316_v49  ;;  %v5219_v7 = vld [vmem:[#allocation19_spill] sm:$0xff] }
 0x4a4   : > { %v2586_v19 = vrot.slane %v2585_v16, 1  ;;  %v2610_v1 = vrot.slane %v2609_v41, 4  ;;  %v2593_v55 = vrot.slane %v2592_v10, 1  ;;  %v2915_v27 = vsel %vm1393_vm11, %v2580_v37, %v2573_v54 }
 0x4a5   : > { %v2598_v14 = vrot.slane %v2597_v28, 2  ;;  %v2605_v62 = vrot.slane %v2604_v43, 2  ;;  %v2509_v44 = vrot.slane %v2445_v5, 1 }
 0x4a6   : > { %v2611_v39 = vadd.f32 %v2610_v1, %v2609_v41  ;;  %v2587_v45 = vadd.f32 %v2586_v19, %v2585_v16  ;;  %v2594_v22 = vadd.f32 %v2593_v55, %v2592_v10  ;;  %v5221_v16 = vld [vmem:[#allocation32_spill] sm:$0xff]  ;;  %v5222_v41 = vld [vmem:[#allocation23_spill] sm:$0xff] }
 0x4a7   : > { %v2599_v13 = vadd.f32 %v2598_v14, %v2597_v28  ;;  %v2606_v21 = vadd.f32 %v2605_v62, %v2604_v43  ;;  %v2616_v20 = vsel %vm2566_vm6, %v2509_v44, 0.0  ;;  %v5223_v55 = vld [vmem:[#allocation12_spill] sm:$0xff] }
 0x4a8   : > { %v2612_v51 = vrot.slane %v2611_v39, 2  ;;  %v2617_v23 = vrot.slane %v2616_v20, 4  ;;  %v2916_v30 = vsel %vm1395_vm12, %v2587_v45, %v2915_v27 }
 0x4a9   : > { %v2600_v2 = vrot.slane %v2599_v13, 1  ;;  %v2607_v52 = vrot.slane %v2606_v21, 1  ;;  %v2917_v29 = vsel %vm1397_vm1, %v2594_v22, %v2916_v30  ;;  %v5225_v30 = vld [vmem:[#allocation20_spill] sm:$0xff] }
 0x4aa   : > { %v2613_v4 = vadd.f32 %v2612_v51, %v2611_v39  ;;  %v2618_v53 = vadd.f32 %v2617_v23, %v2616_v20  ;;  %v5224_v20 = vld [vmem:[#allocation22_spill] sm:$0xff] }
 0x4ab   : > { %v2601_v42 = vadd.f32 %v2600_v2, %v2599_v13  ;;  %v2608_v15 = vadd.f32 %v2607_v52, %v2606_v21 }
 0x4ac   : > { %v2614_v18 = vrot.slane %v2613_v4, 1  ;;  %v2619_v33 = vrot.slane %v2618_v53, 2 }
 0x4ad   : > { %v2918_v57 = vsel %vm1399_vm2, %v2601_v42, %v2917_v29 }
 0x4ae   : > { %v2620_v60 = vadd.f32 %v2619_v33, %v2618_v53  ;;  %v2615_v8 = vadd.f32 %v2614_v18, %v2613_v4  ;;  %v2919_v17 = vsel %vm1401_vm3, %v2608_v15, %v2918_v57 }
 0x4b0   : > { %v2621_v0 = vrot.slane %v2620_v60, 1  ;;  %v2920_v3 = vsel %vm1403_vm5, %v2615_v8, %v2919_v17  ;;  %v5226_v17 = vld [vmem:[#allocation11_spill] sm:$0xff] }
 0x4b2   : > { %v2622_v46 = vadd.f32 %v2621_v0, %v2620_v60 }
 0x4b4   : > { %v2921_v26 = vsel %vm1405_vm8, %v2622_v46, %v2920_v3 }
 0x4b5   : > { %2943 = vrot.lane.b32.xlu1 %v2921_v26, %s3761_s29 }
 0x4b6   : > { %v2401_v59 = vpop.permute.xlu1 %2400 }
 0x4b7   : > { %v2462_v40 = vmul.f32 %v2401_v59, %v5219_v7  ;;  %v2406_v36 = vpop.permute.xlu0 %2405  ;;  %v5239_v7 = vld [vmem:[#allocation34_spill] sm:$0xff] }
 0x4b8   : > { %v2463_v9 = vmul.f32 %v5220_v35, %v2406_v36 }
 0x4b9   : > { %v2526_v58 = vrot.slane %v2462_v40, 1 }
 0x4ba   : > { %v2527_v32 = vrot.slane %v2463_v9, 1  ;;  %v2421_v25 = vpop.permute.xlu1 %2420 }
 0x4bb   : > { %v2735_v11 = vsel %vm2566_vm6, %v2526_v58, 0.0  ;;  %v2466_v10 = vmul.f32 %v2421_v25, %v5221_v16  ;;  %v2411_v49 = vpop.permute.xlu0 %2410  ;;  %v5238_v16 = vld [vmem:[#allocation27_spill] sm:$0xff] }
 0x4bc   : > { %v2736_v28 = vrot.slane %v2735_v11, 4  ;;  %v2742_v43 = vsel %vm2566_vm6, %v2527_v32, 0.0  ;;  %v2464_v5 = vmul.f32 %v2411_v49, %v5222_v41 }
 0x4bd   : > { %v2743_v37 = vrot.slane %v2742_v43, 4  ;;  %v2530_v19 = vrot.slane %v2466_v10, 1  ;;  %v5227_v10 = vld [vmem:[#allocation24_spill] sm:$0xff] }
 0x4be   : > { %v2737_v1 = vadd.f32 %v2736_v28, %v2735_v11  ;;  %v2528_v54 = vrot.slane %v2464_v5, 1  ;;  %v2321_v14 = vpop.permute.xlu1 %2320 }
 0x4bf   : > { %v2744_v62 = vadd.f32 %v2743_v37, %v2742_v43  ;;  %v2763_v44 = vsel %vm2566_vm6, %v2530_v19, 0.0  ;;  %v2446_v39 = vmul.f32 %v2321_v14, %v5223_v55  ;;  %v2416_v45 = vpop.permute.xlu0 %2415 }
 0x4c0   : > { %v2738_v13 = vrot.slane %v2737_v1, 2  ;;  %v2749_v21 = vsel %vm2566_vm6, %v2528_v54, 0.0  ;;  %v2465_v51 = vmul.f32 %v5224_v20, %v2416_v45  ;;  %v2764_v63 = vrot.slane %v2763_v44, 4 }
 0x4c1   : > { %v2745_v23 = vrot.slane %v2744_v62, 2  ;;  %v2750_v27 = vrot.slane %v2749_v21, 4  ;;  %v2510_v2 = vrot.slane %v2446_v39, 1  ;;  %v5228_v39 = vld [vmem:[#allocation16_spill] sm:$0xff] }
 0x4c2   : > { %v2529_v22 = vrot.slane %v2465_v51, 1  ;;  %v2341_v52 = vpop.permute.xlu1 %2340  ;;  %v2739_v33 = vadd.f32 %v2738_v13, %v2737_v1  ;;  %v2765_v8 = vadd.f32 %v2764_v63, %v2763_v44  ;;  %v5229_v13 = vld [vmem:[#allocation21_spill] sm:$0xff] }
 0x4c3   : > { %v2751_v4 = vadd.f32 %v2750_v27, %v2749_v21  ;;  %v2623_v53 = vsel %vm2566_vm6, %v2510_v2, 0.0  ;;  %v2450_v42 = vmul.f32 %v2341_v52, %v5225_v30  ;;  %v2326_v18 = vpop.permute.xlu0 %2325  ;;  %v2746_v29 = vadd.f32 %v2745_v23, %v2744_v62 }
 0x4c4   : > { %v2624_v15 = vrot.slane %v2623_v53, 4  ;;  %v2756_v60 = vsel %vm2566_vm6, %v2529_v22, 0.0  ;;  %v2447_v3 = vmul.f32 %v5226_v17, %v2326_v18  ;;  %v2740_v36 = vrot.slane %v2739_v33, 1 }
 0x4c5   : > { %v2514_v57 = vrot.slane %v2450_v42, 1  ;;  %v2752_v0 = vrot.slane %v2751_v4, 2  ;;  %v2757_v46 = vrot.slane %v2756_v60, 4  ;;  %v2747_v25 = vrot.slane %v2746_v29, 1 }
 0x4c6   : > { %v2351_v26 = vpop.permute.xlu1 %2350  ;;  %v2625_v9 = vadd.f32 %v2624_v15, %v2623_v53  ;;  %v2511_v32 = vrot.slane %v2447_v3, 1  ;;  %v2766_v11 = vrot.slane %v2765_v8, 2  ;;  %v4892_v62 = vadd.f32 %v2740_v36, %v2739_v33  ;;  %v5230_v15 = vld [vmem:[#allocation13_spill] sm:$0xff] }
 0x4c7   : > { %v2651_v59 = vsel %vm2566_vm6, %v2514_v57, 0.0  ;;  %v2331_v40 = vpop.permute.xlu0 %2330  ;;  %v2452_v49 = vmul.f32 %v2351_v26, %v5227_v10  ;;  %v2753_v28 = vadd.f32 %v2752_v0, %v2751_v4  ;;  %v2758_v43 = vadd.f32 %v2757_v46, %v2756_v60 }
 0x4c8   : > { %v2652_v58 = vrot.slane %v2651_v59, 4  ;;  %v2630_v5 = vsel %vm2566_vm6, %v2511_v32, 0.0  ;;  %v2626_v44 = vrot.slane %v2625_v9, 2  ;;  %v2448_v45 = vmul.f32 %v2331_v40, %v5228_v39 }
 0x4c9   : > { %v2631_v1 = vrot.slane %v2630_v5, 4  ;;  %v2516_v54 = vrot.slane %v2452_v49, 1  ;;  %v4896_v51 = vadd.f32 %v2747_v25, %v2746_v29  ;;  %v4898_v23 = vadd.f32 %v2766_v11, %v2765_v8  ;;  %v5231_v8 = vld [vmem:[#allocation26_spill] sm:$0xff] }
 0x4ca   : > { %v2356_v37 = vpop.permute.xlu1 %2355  ;;  %v2653_v19 = vadd.f32 %v2652_v58, %v2651_v59  ;;  %v2754_v2 = vrot.slane %v2753_v28, 1  ;;  %v2759_v22 = vrot.slane %v2758_v43, 2  ;;  %v2512_v4 = vrot.slane %v2448_v45, 1 }
 0x4cb   : > { %v2336_v14 = vpop.permute.xlu0 %2335  ;;  %v2453_v21 = vmul.f32 %v5229_v13, %v2356_v37  ;;  %v2632_v63 = vadd.f32 %v2631_v1, %v2630_v5  ;;  %v2665_v27 = vsel %vm2566_vm6, %v2516_v54, 0.0  ;;  %v2627_v0 = vadd.f32 %v2626_v44, %v2625_v9  ;;  %v5232_v1 = vld [vmem:[#allocation17_spill] sm:$0xff] }
 0x4cc   : > { %v2666_v52 = vrot.slane %v2665_v27, 4  ;;  %v2654_v42 = vrot.slane %v2653_v19, 2  ;;  %v2449_v60 = vmul.f32 %v5230_v15, %v2336_v14  ;;  %v2637_v29 = vsel %vm2566_vm6, %v2512_v4, 0.0 }
 0x4cd   : > { %v2633_v18 = vrot.slane %v2632_v63, 2  ;;  %v2517_v33 = vrot.slane %v2453_v21, 1  ;;  %v2638_v59 = vrot.slane %v2637_v29, 4  ;;  %v4905_v58 = vadd.f32 %v2759_v22, %v2758_v43 }
 0x4ce   : > { %v2361_v53 = vpop.permute.xlu1 %2360  ;;  %v2667_v46 = vadd.f32 %v2666_v52, %v2665_v27  ;;  %v2513_v36 = vrot.slane %v2449_v60, 1  ;;  %v2655_v5 = vadd.f32 %v2654_v42, %v2653_v19  ;;  %v2628_v4 = vrot.slane %v2627_v0, 1 }
 0x4cf   : > { %v2346_v57 = vpop.permute.xlu0 %2345  ;;  %v2454_v3 = vmul.f32 %v2361_v53, %v5231_v8  ;;  %v2634_v26 = vadd.f32 %v2633_v18, %v2632_v63  ;;  %v2672_v40 = vsel %vm2566_vm6, %v2517_v33, 0.0  ;;  %v2639_v37 = vadd.f32 %v2638_v59, %v2637_v29  ;;  %v5233_v33 = vld [vmem:[#allocation31_spill] sm:$0xff] }
 0x4d0   : > { %v2668_v32 = vrot.slane %v2667_v46, 2  ;;  %v2673_v25 = vrot.slane %v2672_v40, 4  ;;  %v2644_v9 = vsel %vm2566_vm6, %v2513_v36, 0.0  ;;  %v2451_v54 = vmul.f32 %v5232_v1, %v2346_v57 }
 0x4d1   : > { %v2518_v11 = vrot.slane %v2454_v3, 1  ;;  %v2635_v44 = vrot.slane %v2634_v26, 1  ;;  %v2645_v21 = vrot.slane %v2644_v9, 4  ;;  %v2640_v52 = vrot.slane %v2639_v37, 2 }
 0x4d2   : > { %v2381_v49 = vpop.permute.xlu1 %2380  ;;  %v2674_v45 = vadd.f32 %v2673_v25, %v2672_v40  ;;  %v2669_v27 = vadd.f32 %v2668_v32, %v2667_v46  ;;  %v2515_v22 = vrot.slane %v2451_v54, 1  ;;  %v4911_v60 = vadd.f32 %v2754_v2, %v2753_v28  ;;  %v5235_v2 = vld [vmem:[#allocation15_spill] sm:$0xff] }
 0x4d3   : > { %v2366_v14 = vpop.permute.xlu0 %2365  ;;  %v2679_v63 = vsel %vm2566_vm6, %v2518_v11, 0.0  ;;  %v2646_v18 = vadd.f32 %v2645_v21, %v2644_v9  ;;  %v2458_v19 = vmul.f32 %v2381_v49, %v5233_v33  ;;  %v2656_v29 = vrot.slane %v2655_v5, 1 }
 0x4d4   : > { %v2680_v43 = vrot.slane %v2679_v63, 4  ;;  %v2675_v53 = vrot.slane %v2674_v45, 2  ;;  %v2641_v57 = vadd.f32 %v2640_v52, %v2639_v37  ;;  %v2658_v3 = vsel %vm2566_vm6, %v2515_v22, 0.0 }
 0x4d5   : > { %v2647_v36 = vrot.slane %v2646_v18, 2  ;;  %v2659_v32 = vrot.slane %v2658_v3, 4  ;;  %v2636_v25 = vadd.f32 %v2635_v44, %v2634_v26  ;;  %v2670_v11 = vrot.slane %v2669_v27, 1 }
 0x4d6   : > { %v2391_v42 = vpop.permute.xlu1 %2390  ;;  %v2681_v46 = vadd.f32 %v2680_v43, %v2679_v63  ;;  %v2522_v54 = vrot.slane %v2458_v19, 1  ;;  %v2455_v9 = vmul.f32 %v5234_v38, %v2366_v14  ;;  %v2629_v21 = vadd.f32 %v2628_v4, %v2627_v0  ;;  %v5236_v4 = vld [vmem:[#allocation28_spill] sm:$0xff] }
 0x4d7   : > { %v2371_v59 = vpop.permute.xlu0 %2370  ;;  %v4916_v49 = vadd.f32 %v2675_v53, %v2674_v45  ;;  %v2660_v28 = vadd.f32 %v2659_v32, %v2658_v3  ;;  %v2460_v48 = vmul.f32 %v2391_v42, %v5235_v2  ;;  %v4919_v52 = vadd.f32 %v2656_v29, %v2655_v5 }
 0x4d8   : > { %v2642_v22 = vrot.slane %v2641_v57, 1  ;;  %v2707_v40 = vsel %vm2566_vm6, %v2522_v54, 0.0  ;;  %v2519_v24 = vrot.slane %v2455_v9, 1  ;;  %v2648_v43 = vadd.f32 %v2647_v36, %v2646_v18  ;;  %v5237_v9 = vld [vmem:[#allocation14_spill] sm:$0xff] }
 0x4d9   : > { %v2682_v26 = vrot.slane %v2681_v46, 2  ;;  %v2708_v44 = vrot.slane %v2707_v40, 4  ;;  %v2524_v19 = vrot.slane %v2460_v48, 1  ;;  %v2922_v14 = vsel %vm1393_vm11, %v2636_v25, %v2629_v21 }
 0x4da   : > { %v2396_v37 = vpop.permute.xlu1 %2395  ;;  %v4923_v0 = vadd.f32 %v2670_v11, %v2669_v27  ;;  %v2686_v45 = vsel %vm2566_vm6, %v2519_v24, 0.0  ;;  %v2456_v53 = vmul.f32 %v2371_v59, %v5236_v4  ;;  %v2661_v42 = vrot.slane %v2660_v28, 2 }
 0x4db   : > { %v2376_v63 = vpop.permute.xlu0 %2375  ;;  %v2709_v29 = vadd.f32 %v2708_v44, %v2707_v40  ;;  %v2687_v3 = vrot.slane %v2686_v45, 4  ;;  %v2643_v54 = vadd.f32 %v2642_v22, %v2641_v57  ;;  %v2721_v18 = vsel %vm2566_vm6, %v2524_v19, 0.0 }
 0x4dc   : > { %v2520_v36 = vrot.slane %v2456_v53, 1  ;;  %v2461_v48 = vmul.f32 %v5237_v9, %v2396_v37  ;;  %v2649_v25 = vrot.slane %v2648_v43, 1  ;;  %v2683_v27 = vadd.f32 %v2682_v26, %v2681_v46 }
 0x4dd   : > { %v2688_v11 = vadd.f32 %v2687_v3, %v2686_v45  ;;  %v2722_v21 = vrot.slane %v2721_v18, 4  ;;  %v2457_v5 = vmul.f32 %v5238_v16, %v2376_v63  ;;  %v2662_v44 = vadd.f32 %v2661_v42, %v2660_v28 }
 0x4de   : > { %v2431_v32 = vpop.permute.xlu1 %2430  ;;  %v2693_v24 = vsel %vm2566_vm6, %v2520_v36, 0.0  ;;  %v2525_v59 = vrot.slane %v2461_v48, 1  ;;  %v2710_v2 = vrot.slane %v2709_v29, 2  ;;  %v2923_v46 = vsel %vm1395_vm12, %v2643_v54, %v2922_v14 }
 0x4df   : > { %v2386_v20 = vpop.permute.xlu0 %2385  ;;  %v2468_v40 = vmul.f32 %v2431_v32, %v5239_v7  ;;  %v2689_v57 = vrot.slane %v2688_v11, 2  ;;  %v2723_v22 = vadd.f32 %v2722_v21, %v2721_v18  ;;  %v2694_v19 = vrot.slane %v2693_v24, 4  ;;  %v5240_v32 = vld [vmem:[#allocation29_spill] sm:$0xff] }
 0x4e0   : > { %v2728_v53 = vsel %vm2566_vm6, %v2525_v59, 0.0  ;;  %v2521_v37 = vrot.slane %v2457_v5, 1  ;;  %v2459_v28 = vmul.f32 %v5240_v32, %v2386_v20  ;;  %v2684_v7 = vrot.slane %v2683_v27, 1  ;;  %v4941_v5 = vld [vmem:[%s5102_s3 + $0xb8] sm:$0xff]  ;;  %v5241_v20 = vld [vmem:[#allocation30_spill] sm:$0xff] }
 0x4e1   : > { %v2532_v9 = vrot.slane %v2468_v40, 1  ;;  %v2690_v26 = vadd.f32 %v2689_v57, %v2688_v11  ;;  %v2724_v45 = vrot.slane %v2723_v22, 2  ;;  %v2729_v3 = vrot.slane %v2728_v53, 4  ;;  %3564 = vmatprep.subr.mxu1 %v4941_v5 }
 0x4e2   : > { %v2695_v36 = vadd.f32 %v2694_v19, %v2693_v24  ;;  %v2700_v48 = vsel %vm2566_vm6, %v2521_v37, 0.0  ;;  %v2663_v18 = vrot.slane %v2662_v44, 1  ;;  %v2711_v21 = vadd.f32 %v2710_v2, %v2709_v29 }
 0x4e3   : > { %v2777_v63 = vsel %vm2566_vm6, %v2532_v9, 0.0  ;;  %v2426_v42 = vpop.permute.xlu0 %2425  ;;  %v2730_v41 = vadd.f32 %v2729_v3, %v2728_v53  ;;  %v2701_v54 = vrot.slane %v2700_v48, 4  ;;  %v2523_v24 = vrot.slane %v2459_v28, 1 }
 0x4e4   : > { %v2696_v14 = vrot.slane %v2695_v36, 2  ;;  %v2778_v11 = vrot.slane %v2777_v63, 4  ;;  %v2650_v59 = vadd.f32 %v2649_v25, %v2648_v43  ;;  %v2691_v9 = vrot.slane %v2690_v26, 1 }
 0x4e5   : > { %v2725_v40 = vadd.f32 %v2724_v45, %v2723_v22  ;;  %v2467_v57 = vmul.f32 %v5241_v20, %v2426_v42  ;;  %v2731_v37 = vrot.slane %v2730_v41, 2  ;;  %v2702_v2 = vadd.f32 %v2701_v54, %v2700_v48 }
 0x4e6   : > { %v2697_v19 = vadd.f32 %v2696_v14, %v2695_v36  ;;  %v2714_v29 = vsel %vm2566_vm6, %v2523_v24, 0.0  ;;  %v2685_v53 = vadd.f32 %v2684_v7, %v2683_v27  ;;  %v2664_v3 = vadd.f32 %v2663_v18, %v2662_v44  ;;  %v5242_v44 = vld [vmem:[#allocation33_spill] sm:$0xff] }
 0x4e7   : > { %v2712_v32 = vrot.slane %v2711_v21, 1  ;;  %v2715_v35 = vrot.slane %v2714_v29, 4  ;;  %v2703_v16 = vrot.slane %v2702_v2, 2  ;;  %v2779_v33 = vadd.f32 %v2778_v11, %v2777_v63  ;;  %v2436_v1 = vpop.permute.xlu0 %2435 }
 0x4e8   : > { %v2698_v13 = vrot.slane %v2697_v19, 1  ;;  %v2531_v28 = vrot.slane %v2467_v57, 1  ;;  %v2692_v8 = vadd.f32 %v2691_v9, %v2690_v26  ;;  %v2726_v43 = vrot.slane %v2725_v40, 1 }
 0x4e9   : > { %v2716_v25 = vadd.f32 %v2715_v35, %v2714_v29  ;;  %v2924_v22 = vsel %vm1397_vm1, %v2650_v59, %v2923_v46  ;;  %v2732_v36 = vadd.f32 %v2731_v37, %v2730_v41  ;;  %v2704_v42 = vadd.f32 %v2703_v16, %v2702_v2 }
 0x4ea   : > { %v2699_v45 = vadd.f32 %v2698_v13, %v2697_v19  ;;  %v2770_v48 = vsel %vm2566_vm6, %v2531_v28, 0.0  ;;  %v2925_v27 = vsel %vm1399_vm2, %v4919_v52, %v2924_v22  ;;  %v2469_v18 = vmul.f32 %v5242_v44, %v2436_v1 }
 0x4eb   : > { %v2717_v14 = vrot.slane %v2716_v25, 2  ;;  %v2771_v7 = vrot.slane %v2770_v48, 4  ;;  %v2705_v63 = vrot.slane %v2704_v42, 1  ;;  %v2780_v54 = vrot.slane %v2779_v33, 2 }
 0x4ec   : > { %v5243_v26 = vrot.slane %v4916_v49, 1  ;;  %v2926_v46 = vsel %vm1401_vm3, %v2664_v3, %v2925_v27  ;;  %v2533_v11 = vrot.slane %v2469_v18, 1  ;;  %v2929_v24 = vsel %vm1393_vm11, %v2692_v8, %v2685_v53 }
 0x4ed   : > { %v2718_v13 = vadd.f32 %v2717_v14, %v2716_v25  ;;  %v2772_v41 = vadd.f32 %v2771_v7, %v2770_v48  ;;  %v2927_v16 = vsel %vm1403_vm5, %v4923_v0, %v2926_v46  ;;  %v2733_v59 = vrot.slane %v2732_v36, 1 }
 0x4ee   : > { %v2678_v35 = vadd.f32 %v5243_v26, %v4916_v49  ;;  %v2706_v52 = vadd.f32 %v2705_v63, %v2704_v42  ;;  %v2930_v9 = vsel %vm1395_vm12, %v2699_v45, %v2929_v24  ;;  %v2784_v49 = vsel %vm2566_vm6, %v2533_v11, 0.0 }
 0x4ef   : > { %v2719_v57 = vrot.slane %v2718_v13, 1  ;;  %v2773_v19 = vrot.slane %v2772_v41, 2  ;;  %v5244_v37 = vrot.slane %v4905_v58, 1  ;;  %v2713_v0 = vadd.f32 %v2712_v32, %v2711_v21 }
 0x4f0   : > { %v2928_v1 = vsel %vm1405_vm8, %v2678_v35, %v2927_v16  ;;  %v2785_v29 = vrot.slane %v2784_v49, 4  ;;  %v2931_v8 = vsel %vm1397_vm1, %v2706_v52, %v2930_v9  ;;  %v2768_v53 = vrot.slane %v4898_v23, 1 }
 0x4f1   : > { %2945 = vrot.lane.b32.xlu0 %v2928_v1, %s3761_s29  ;;  %v2762_v2 = vadd.f32 %v5244_v37, %v4905_v58  ;;  %v2781_v3 = vadd.f32 %v2780_v54, %v2779_v33  ;;  %v2720_v28 = vadd.f32 %v2719_v57, %v2718_v13  ;;  %v2774_v25 = vadd.f32 %v2773_v19, %v2772_v41  ;;  %v2980_v19 = vld [vmem:[%s5102_s3 + $0xa0] sm:$0xff]  ;;  %v2965_v37 = vld [vmem:[%s5102_s3 + $0x28] sm:$0xff] }
 0x4f2   : > { %v2936_v22 = vsel %vm1393_vm11, %v4896_v51, %v4892_v62  ;;  %v2727_v45 = vadd.f32 %v2726_v43, %v2725_v40  ;;  %v2786_v42 = vadd.f32 %v2785_v29, %v2784_v49  ;;  %v2932_v48 = vsel %vm1399_vm2, %v2713_v0, %v2931_v8  ;;  %v2971_v49 = vld [vmem:[%s5102_s3 + $0x58] sm:$0xff] }
 0x4f3   : > { %v2937_v58 = vsel %vm1395_vm12, %v4911_v60, %v2936_v22  ;;  %v2775_v32 = vrot.slane %v2774_v25, 1  ;;  %v2734_v21 = vadd.f32 %v2733_v59, %v2732_v36  ;;  %v2933_v14 = vsel %vm1401_vm3, %v2720_v28, %v2932_v48 }
 0x4f4   : > { %v2787_v7 = vrot.slane %v2786_v42, 2  ;;  %v2934_v33 = vsel %vm1403_vm5, %v2727_v45, %v2933_v14  ;;  %v2938_v27 = vsel %vm1397_vm1, %v2762_v2, %v2937_v58  ;;  %v2769_v18 = vadd.f32 %v2768_v53, %v4898_v23  ;;  %v2962_v2 = vld [vmem:[%s5102_s3 + $0x10] sm:$0xff] }
 0x4f5   : > { %v2782_v63 = vrot.slane %v2781_v3, 1  ;;  %v2776_v62 = vadd.f32 %v2775_v32, %v2774_v25  ;;  %v2935_v51 = vsel %vm1405_vm8, %v2734_v21, %v2934_v33  ;;  %v2823_v23 = vrot.slane %v5211_v56, 7  ;;  %v5250_v33 = vld [vmem:[#allocation21_spill] sm:$0xff] }
 0x4f6   : > { %v2788_v40 = vadd.f32 %v2787_v7, %v2786_v42  ;;  %2947 = vrot.lane.b32.xlu1 %v2935_v51, %s3761_s29  ;;  %v2939_v60 = vsel %vm1399_vm2, %v2769_v18, %v2938_v27  ;;  %v2825_v13 = vrot.slane %v5213_v61, 6  ;;  %v2829_v11 = vrot.slane %v5215_v50, 4 }
 0x4f7   : > { %v2940_v36 = vsel %vm1401_vm3, %v2776_v62, %v2939_v60  ;;  %v2783_v54 = vadd.f32 %v2782_v63, %v2781_v3  ;;  %v2824_v41 = vsel %vm1393_vm11, %v2823_v23, %v5212_v6  ;;  %v2827_v24 = vrot.slane %v5214_v47, 5  ;;  %v5252_v62 = vld [vmem:[#allocation23_spill] sm:$0xff] }
 0x4f8   : > { %v2789_v43 = vrot.slane %v2788_v40, 1  ;;  %v2826_v16 = vsel %vm1395_vm12, %v2825_v13, %v2824_v41  ;;  %v2833_v1 = vrot.slane %v5217_v31, 2  ;;  %v2831_v9 = vrot.slane %v5216_v34, 3  ;;  %v2977_v31 = vld [vmem:[%s5102_s3 + $0x88] sm:$0xff] }
 0x4f9   : > { %v2941_v35 = vsel %vm1403_vm5, %v2783_v54, %v2940_v36  ;;  %v2828_v59 = vsel %vm1397_vm1, %v2827_v24, %v2826_v16  ;;  %v2835_v6 = vrot.slane %v5218_v12, 1  ;;  %v5245_v34 = vmov 0.0   ;;  %v2974_v12 = vld [vmem:[%s5102_s3 + $0x70] sm:$0xff]  ;;  %v5255_v23 = vld [vmem:[#allocation19_spill] sm:$0xff]  ;;  %v5257_v24 = vld [vmem:[#allocation22_spill] sm:$0xff] }
 0x4fa   : > { %v2790_v26 = vadd.f32 %v2789_v43, %v2788_v40  ;;  %v2830_v52 = vsel %vm1399_vm2, %v2829_v11, %v2828_v59  ;;  %v2837_v0 = vrot.slane %v5226_v17, 7  ;;  %v2839_v29 = vrot.slane %v5228_v39, 6  ;;  %v5246_v39 = vld [vmem:[#allocation26_spill] sm:$0xff]  ;;  %v5253_v40 = vld [vmem:[#allocation29_spill] sm:$0xff]  ;;  %v5256_v16 = vld [vmem:[#allocation32_spill] sm:$0xff] }
 0x4fb   : > { %v2832_v56 = vsel %vm1401_vm3, %v2831_v9, %v2830_v52  ;;  %v2843_v3 = vrot.slane %v5225_v30, 4  ;;  %v2851_v28 = vrot.slane %v5234_v38, 7  ;;  %v2841_v25 = vrot.slane %v5230_v15, 5  ;;  %v5248_v30 = vld [vmem:[#allocation31_spill] sm:$0xff] }
 0x4fc   : > { %v2942_v46 = vsel %vm1405_vm8, %v2790_v26, %v2941_v35  ;;  %v2834_v61 = vsel %vm1403_vm5, %v2833_v1, %v2832_v56  ;;  %v2838_v8 = vsel %vm1393_vm11, %v2837_v0, %v5223_v55  ;;  %v2853_v22 = vrot.slane %v5236_v4, 6  ;;  %v5247_v55 = vld [vmem:[#allocation17_spill] sm:$0xff]  ;;  %v5249_v38 = vld [vmem:[#allocation27_spill] sm:$0xff]  ;;  %v5258_v1 = vld [vmem:[#allocation14_spill] sm:$0xff] }
 0x4fd   : > { %2949 = vrot.lane.b32.xlu0 %v2942_v46, %s3761_s29  ;;  %v2836_v57 = vsel %vm1405_vm8, %v2835_v6, %v2834_v61  ;;  %v2840_v53 = vsel %vm1395_vm12, %v2839_v29, %v2838_v8  ;;  %v2847_v17 = vrot.slane %v5227_v10, 2  ;;  %v2852_v48 = vsel %vm1393_vm11, %v2851_v28, %v5246_v39  ;;  %v5251_v10 = vld [vmem:[#allocation18_spill] sm:$0xff]  ;;  %v5254_v35 = vld [vmem:[#allocation15_spill] sm:$0xff]  ;;  %s226_s29 = scalar_lea.vmem %s5104_s5, %s3308_s26 }
 0x4fe   : > { %v2842_v45 = vsel %vm1397_vm1, %v2841_v25, %v2840_v53  ;;  %v2845_v58 = vrot.slane %v5247_v55, 3  ;;  %v2854_v32 = vsel %vm1395_vm12, %v2853_v22, %v2852_v48  ;;  %v2857_v21 = vrot.slane %v5248_v30, 4  ;;  %v5259_v6 = vld [vmem:[#allocation34_spill] sm:$0xff]  ;;  %v5260_v28 = vld [vmem:[#allocation35_spill] sm:$0xff]  ;;  %v5262_v55 = vld [vmem:[#allocation36_spill] sm:$0xff] }
 0x4ff   : > { %v2844_v42 = vsel %vm1399_vm2, %v2843_v3, %v2842_v45  ;;  %v2855_v14 = vrot.slane %v5249_v38, 5  ;;  %v2849_v27 = vrot.slane %v5250_v33, 1  ;;  %v2865_v18 = vrot.slane %v5251_v10, 7  ;;  %v2984_v3 = vld [vmem:[%s5103_s4] sm:$0x7] }
 0x500   : > { %v2846_v15 = vsel %vm1401_vm3, %v2845_v58, %v2844_v42  ;;  %v2867_v51 = vrot.slane %v5252_v62, 6  ;;  %v2859_v60 = vrot.slane %v5253_v40, 3  ;;  %v2861_v46 = vrot.slane %v5254_v35, 2  ;;  %v5261_v22 = vld [vmem:[#allocation2_spill] sm:$0xff] }
 0x501   : > { %v2856_v4 = vsel %vm1397_vm1, %v2855_v14, %v2854_v32  ;;  %v2848_v7 = vsel %vm1403_vm5, %v2847_v17, %v2846_v15  ;;  %v2866_v13 = vsel %vm1393_vm11, %v2865_v18, %v5255_v23  ;;  %v2871_v11 = vrot.slane %v5256_v16, 4 }
 0x502   : > { %v2858_v63 = vsel %vm1399_vm2, %v2857_v21, %v2856_v4  ;;  %v2850_v43 = vsel %vm1405_vm8, %v2849_v27, %v2848_v7  ;;  %v2868_v41 = vsel %vm1395_vm12, %v2867_v51, %v2866_v13  ;;  %v2869_v59 = vrot.slane %v5257_v24, 5 }
 0x503   : > { %v2860_v26 = vsel %vm1401_vm3, %v2859_v60, %v2858_v63  ;;  %v2863_v9 = vrot.slane %v5258_v1, 1  ;;  %v2993_v25 = vrot.slane %v2984_v3, %v5260_v28  ;;  %v2989_v45 = vrot.slane %v2984_v3, %v5261_v22 }
 0x504   : > { %v2862_v52 = vsel %vm1403_vm5, %v2861_v46, %v2860_v26  ;;  %v2870_v56 = vsel %vm1397_vm1, %v2869_v59, %v2868_v41  ;;  %v2997_v58 = vrot.slane %v2984_v3, %v5262_v55 }
 0x505   : > { %v2872_v61 = vsel %vm1399_vm2, %v2871_v11, %v2870_v56 }
 0x527   : > { %v2944_v50 = vpop.permute.xlu1 %2943 }
 0x528   : > { %v5000_v47 = vsel %vm2955_vm7, %v2836_v57, %v2944_v50  ;;  %v2875_v57 = vrot.slane %v5259_v6, 2  ;;  %v2864_v50 = vsel %vm1405_vm8, %v2863_v9, %v2862_v52 }
 0x529   : > { %3438 = vmatmul.mubr.msk.f32.vlgmr.msra.gmra.mxu1 %vm462_vm0, %v5000_v47 }
 0x52a   : > { %3083 = vmatprep.mubr.f32.mxu1 %v5245_v34  ;;  %3565 = vmatpush3.msra.mxu1 %v4941_v5  ;;  %v2968_v5 = vld [vmem:[%s5102_s3 + $0x40] sm:$0xff] }
 0x52b   : > { %3566 = vmatprep.subr.mxu1 %v2980_v19 }
 0x52c   : > { %3567 = vmatpush3.msra.mxu1 %v2980_v19 }
 0x52d   : > { %3568 = vmatprep.subr.mxu1 %v2977_v31 }
 0x52e   : > { %3569 = vmatpush3.msra.mxu1 %v2977_v31  ;;  %v2873_v31 = vrot.slane %v5241_v20, 3 }
 0x52f   : > { %3570 = vmatprep.subr.mxu1 %v2974_v12 }
 0x530   : > { %3571 = vmatpush3.msra.mxu1 %v2974_v12 }
 0x531   : > { %3572 = vmatprep.subr.mxu1 %v2971_v49 }
 0x532   : > { %3573 = vmatpush3.msra.mxu1 %v2971_v49  ;;  %v2874_v49 = vsel %vm1401_vm3, %v2873_v31, %v2872_v61 }
 0x533   : > { %3574 = vmatprep.subr.mxu1 %v2968_v5 }
 0x534   : > { %3575 = vmatpush3.msra.mxu1 %v2968_v5  ;;  %v2876_v5 = vsel %vm1403_vm5, %v2875_v57, %v2874_v49 }
 0x535   : > { %3576 = vmatprep.subr.mxu1 %v2965_v37 }
 0x536   : > { %3577 = vmatpush3.msra.mxu1 %v2965_v37  ;;  %v2877_v37 = vrot.slane %v5242_v44, 1 }
 0x537   : > { %3578 = vmatprep.subr.mxu1 %v2962_v2 }
 0x538   : > { %3579 = vmatpush3.msra.mxu1 %v2962_v2  ;;  %v2878_v2 = vsel %vm1405_vm8, %v2877_v37, %v2876_v5 }
 0x563   : > { %v2946_v36 = vpop.permute.xlu0 %2945 }
 0x564   : > { %v2957_v54 = vsel %vm2955_vm7, %v2850_v43, %v2946_v36 }
 0x565   : > { %3439 = vmatmul.mubr.msk.f32.gmra.mxu1 %vm462_vm0, %v2957_v54 }
 0x566   : > { %3089 = vmatprep.mubr.f32.mxu1 %v5245_v34 }
 0x568   : > { %v2948_v19 = vpop.permute.xlu1 %2947 }
 0x569   : > { %v2958_v12 = vsel %vm2955_vm7, %v2864_v50, %v2948_v19 }
 0x56a   : > { %3440 = vmatmul.mubr.msk.f32.gmra.mxu1 %vm462_vm0, %v2958_v12 }
 0x56b   : > { %3095 = vmatprep.mubr.f32.mxu1 %v5245_v34 }
 0x56f   : > { %v2950_v0 = vpop.permute.xlu0 %2949 }
 0x570   : > { %v2959_v29 = vsel %vm2955_vm7, %v2878_v2, %v2950_v0 }
 0x571   : > { %3441 = vmatmul.mubr.msk.f32.gmra.mxu1 %vm462_vm0, %v2959_v29 }
 0x572   : > { %3580 = vmatprep.mubr.msk.f32.mxu1 %vm462_vm0, %v5000_v47 }
 0x575   : > { %3581 = vmatmul.mubr.msk.f32.vlgmr.msra.gmra.mxu1 %vm462_vm0, %v2957_v54 }
 0x576   : > { %3583 = vmatprep.mubr.msk.f32.mxu1 %vm462_vm0, %v2958_v12 }
 0x579   : > { %3584 = vmatmul.mubr.msk.f32.gmra.mxu1 %vm462_vm0, %v2959_v29  ;;  %vm3241_vm0 = vcmask 7168  }
 0x5e9   : > { %v3079_v20 = vpop.f32.mrf.mxu1 }
 0x5ea   : > { %v3080_v32 = vadd.f32 %v3079_v20, %v2989_v45 }
 0x5eb   : > { %v3081_v34 = vpop.f32.mrf.mxu1 }
 0x5ec   : > { %v3082_v17 = vadd.f32 %v3081_v34, %v2993_v25  ;;  %v3201_v27 = vmul.f32 %v3080_v32, %v3080_v32 }
 0x5ee   : > { %v3202_v38 = vmul.f32 %v3082_v17, %v3082_v17 }
 0x5f0   : > { %v3207_v60 = vadd.f32 %v3202_v38, %v3201_v27 }
 0x625   : > { %v3085_v8 = vpop.f32.mrf.mxu1 }
 0x626   : > { %v3086_v48 = vadd.f32 %v3085_v8, %v2989_v45 }
 0x627   : > { %v3087_v44 = vpop.f32.mrf.mxu1 }
 0x628   : > { %v3088_v42 = vadd.f32 %v3087_v44, %v2993_v25  ;;  %v3204_v4 = vmul.f32 %v3086_v48, %v3086_v48 }
 0x62a   : > { %v3091_v53 = vpop.f32.mrf.mxu1  ;;  %v3205_v21 = vmul.f32 %v3088_v42, %v3088_v42 }
 0x62b   : > { %v3092_v10 = vadd.f32 %v3091_v53, %v2989_v45 }
 0x62c   : > { %v3093_v47 = vpop.f32.mrf.mxu1  ;;  %v3211_v63 = vadd.f32 %v3205_v21, %v3204_v4 }
 0x62d   : > { %v3094_v14 = vadd.f32 %v3093_v47, %v2993_v25  ;;  %v3215_v23 = vmul.f32 %v3092_v10, %v3092_v10  ;;  %v3187_v61 = vmul.f32 %v3092_v10, %v3080_v32 }
 0x62f   : > { %v3216_v43 = vmul.f32 %v3094_v14, %v3094_v14  ;;  %v3188_v59 = vmul.f32 %v3094_v14, %v3082_v17 }
 0x631   : > { %v3097_v39 = vpop.f32.mrf.mxu1  ;;  %v3221_v52 = vadd.f32 %v3216_v43, %v3215_v23  ;;  %v3193_v12 = vadd.f32 %v3188_v59, %v3187_v61 }
 0x632   : > { %v3098_v62 = vadd.f32 %v3097_v39, %v2989_v45 }
 0x633   : > { %v3099_v30 = vpop.f32.mrf.mxu1 }
 0x634   : > { %v3100_v7 = vadd.f32 %v3099_v30, %v2993_v25  ;;  %v3218_v41 = vmul.f32 %v3098_v62, %v3098_v62  ;;  %v3190_v6 = vmul.f32 %v3098_v62, %v3086_v48 }
 0x635   : > { %v3582_v15 = vpop.f32.mrf.mxu1 }
 0x636   : > { %v3174_v33 = vadd.f32 %v3582_v15, %v2997_v58  ;;  %v3219_v54 = vmul.f32 %v3100_v7, %v3100_v7  ;;  %v3191_v1 = vmul.f32 %v3100_v7, %v3088_v42 }
 0x637   : > { %v3168_v18 = vpop.f32.mrf.mxu1 }
 0x638   : > { %v3206_v51 = vmul.f32 %v3174_v33, %v3174_v33  ;;  %v3169_v40 = vadd.f32 %v3168_v18, %v2997_v58  ;;  %v3225_v9 = vadd.f32 %v3219_v54, %v3218_v41  ;;  %v3197_v49 = vadd.f32 %v3191_v1, %v3190_v6 }
 0x639   : > { %v3585_v36 = vpop.f32.mrf.mxu1 }
 0x63a   : > { %v3203_v26 = vmul.f32 %v3169_v40, %v3169_v40  ;;  %v3184_v35 = vadd.f32 %v3585_v36, %v2997_v58  ;;  %v3212_v46 = vadd.f32 %v3211_v63, %v3206_v51 }
 0x63b   : > { %v3178_v13 = vpop.f32.mrf.mxu1 }
 0x63c   : > { %v3220_v16 = vmul.f32 %v3184_v35, %v3184_v35  ;;  %v3179_v11 = vadd.f32 %v3178_v13, %v2997_v58  ;;  %3213 = vadd.xlane.f32.xlu0 %v3212_v46  ;;  %v3208_v24 = vadd.f32 %v3207_v60, %v3203_v26  ;;  %v3192_v57 = vmul.f32 %v3184_v35, %v3174_v33 }
 0x63e   : > { %v3217_v56 = vmul.f32 %v3179_v11, %v3179_v11  ;;  %3209 = vadd.xlane.f32.xlu1 %v3208_v24  ;;  %v3189_v50 = vmul.f32 %v3179_v11, %v3169_v40  ;;  %v3226_v31 = vadd.f32 %v3225_v9, %v3220_v16  ;;  %v3198_v37 = vadd.f32 %v3197_v49, %v3192_v57 }
 0x640   : > { %v3222_v19 = vadd.f32 %v3221_v52, %v3217_v56  ;;  %v3194_v5 = vadd.f32 %v3193_v12, %v3189_v50 }
 0x642   : > { %3223 = vadd.xlane.f32.xlu0 %v3222_v19  ;;  %3227 = vadd.xlane.f32.xlu1 %v3226_v31 }
 0x646   : > { %3195 = vadd.xlane.f32.xlu0 %v3194_v5  ;;  %3199 = vadd.xlane.f32.xlu1 %v3198_v37 }
 0x6c5   : > { %v3214_v2 = vpop.xlane.xlu0 %3213 }
 0x6c6   : > { %v3230_v0 = vmax.f32 %v3214_v2, 1e-16 }
 0x6c7   : > { %v3210_v29 = vpop.xlane.xlu1 %3209 }
 0x6c8   : > { %v3229_v20 = vmax.f32 %v3210_v29, 1e-16 }
 0x6ca   : > { %3743 = vrsqrt.f32 %v3229_v20 }
 0x6cb   : > { %3745 = vrsqrt.f32 %v3230_v0  ;;  %v3224_v34 = vpop.xlane.xlu0 %3223  ;;  %v3228_v8 = vpop.xlane.xlu1 %3227 }
 0x6cc   : > { %v3235_v44 = vmax.f32 %v3224_v34, 1e-16  ;;  %v3236_v53 = vmax.f32 %v3228_v8, 1e-16 }
 0x6ce   : > { %3747 = vrsqrt.f32 %v3235_v44 }
 0x6cf   : > { %3749 = vrsqrt.f32 %v3236_v53  ;;  %v3196_v25 = vpop.xlane.xlu0 %3195  ;;  %v3200_v45 = vpop.xlane.xlu1 %3199 }
 0x6d7   : > { %v3744_v3 = vpop.eup %3743 }
 0x6d8   : > { %v3746_v28 = vpop.eup %3745  ;;  %v3233_v22 = vmul.f32 %v3744_v3, %v3196_v25 }
 0x6d9   : > { %v3234_v42 = vmul.f32 %v3746_v28, %v3200_v45 }
 0x6db   : > { %v3748_v47 = vpop.eup %3747 }
 0x6dc   : > { %v3750_v17 = vpop.eup %3749  ;;  %v3239_v39 = vmul.f32 %v3748_v47, %v3233_v22 }
 0x6dd   : > { %v3240_v48 = vmul.f32 %v3750_v17, %v3234_v42 }
 0x6de   : > { %3242 = vst.msk [vmem:[%s226_s29] sm:$0xff] %vm3241_vm0, %v3239_v39 }
 0x6df   : > { %3243 = vst.msk [vmem:[%s226_s29 + $0x8] sm:$0xff] %vm3241_vm0, %v3240_v48 }
 0x6e0 PF: > { %s15_s18 = sadd.s32 1, %s3757_s18  }
 0x6e1   : > { %p12_p5 = scmp.ge.s32.totalorder %s15_s18, 4  }
 0x6e3   :  { %14 = sbr.rel (!%p12_p5) target bundleno = 1 (0x1), region = 70 }

</bundles_post_ra>
